<compile_context>
chip_gen: v6e
topology: v6e:2x2x1
jax: 0.10.0
libtpu: 0.0.40
codegen_flags: <defaults>
</compile_context>

<pallas_src>
import functools

import numpy as np
import jax
import jax.numpy as jnp
from jax.experimental import pallas as pl
from jax.experimental.pallas import tpu as pltpu


# ----------------------------------------------------------------------------
# Host-side (numpy, cached) constant matrices: conv taps / avg-pool as matmuls
# over the flattened-spatial (lane) dimension.
# ----------------------------------------------------------------------------
@functools.lru_cache(maxsize=None)
def _conv3x3_gather_mats(in_h, in_w, out_h, out_w, stride, pad):
    """(9, in_h*in_w, out_h*out_w) 0/1 matrices; tap t = dy*3 + dx."""
    i = np.arange(out_h * out_w)
    oy, ox = i // out_w, i % out_w
    j = np.arange(in_h * in_w)
    mats = []
    for dy in range(3):
        for dx in range(3):
            r = oy * stride + dy - pad
            c = ox * stride + dx - pad
            valid = (r >= 0) & (r < in_h) & (c >= 0) & (c < in_w)
            src = r * in_w + c
            m = (j[:, None] == src[None, :]) & valid[None, :]
            mats.append(m.astype(np.float32))
    return np.stack(mats, axis=0)


@functools.lru_cache(maxsize=None)
def _avgpool2x2_mat(in_h, in_w):
    """(in_h*in_w, (in_h//2)*(in_w//2)) matrix implementing AvgPool2d(2, 2)."""
    out_h, out_w = in_h // 2, in_w // 2
    i = np.arange(out_h * out_w)
    oy, ox = i // out_w, i % out_w
    j = np.arange(in_h * in_w)
    r, c = j // in_w, j % in_w
    m = ((r[:, None] // 2) == oy[None, :]) & ((c[:, None] // 2) == ox[None, :])
    return m.astype(np.float32) * 0.25


def _round_up(v, m):
    return ((v + m - 1) // m) * m


# ----------------------------------------------------------------------------
# Fused kernel.  All activations are (batch*channels, flattened_spatial):
# channels/batch on sublanes, spatial on lanes.
# ----------------------------------------------------------------------------
def basicblock_kernel(x_ref, ga_ref, gp_ref, gb_ref, wa_ref, wf_ref,
                      o_ref, ta_ref, tb_ref):
    x = x_ref[...]                                    # (N*Cin, s_in)   f32
    s_out = o_ref.shape[1]
    n_taps = ga_ref.shape[0]                          # 9
    rows_x = x.shape[0]                               # N*Cin

    # ---- conv_a gather stage: 9 tap matmuls -> aligned row blocks of ta ----
    for t in range(n_taps):
        ta_ref[pl.ds(t * rows_x, rows_x), :] = jnp.dot(
            x, ga_ref[t], preferred_element_type=jnp.float32)

    # ones row (bias) + zero padding rows
    ka = ta_ref.shape[0]
    used_a = n_taps * rows_x
    pad_a = ka - used_a
    row_ids = jax.lax.broadcasted_iota(jnp.int32, (pad_a, s_out), 0)
    ta_ref[pl.ds(used_a, pad_a), :] = jnp.where(row_ids == 0, 1.0, 0.0)

    # ---- conv_a: one long-K weight matmul (BN scale+bias folded), ReLU -----
    a1 = jnp.maximum(
        jnp.dot(wa_ref[...], ta_ref[...], preferred_element_type=jnp.float32),
        0.0)                                          # (N*Cout, s_out)
    rows_a = a1.shape[0]                              # N*Cout

    # ---- conv_b gather stage + pooled shortcut -> row blocks of tb ---------
    for t in range(n_taps):
        tb_ref[pl.ds(t * rows_a, rows_a), :] = jnp.dot(
            a1, gb_ref[t], preferred_element_type=jnp.float32)

    used_b = n_taps * rows_a
    tb_ref[pl.ds(used_b, rows_x), :] = jnp.dot(
        x, gp_ref[...], preferred_element_type=jnp.float32)   # AvgPool2x2
    used_b += rows_x

    kb = tb_ref.shape[0]
    pad_b = kb - used_b
    row_ids_b = jax.lax.broadcasted_iota(jnp.int32, (pad_b, s_out), 0)
    tb_ref[pl.ds(used_b, pad_b), :] = jnp.where(row_ids_b == 0, 1.0, 0.0)

    # ---- conv_b + BN bias + 1x1-downsample residual in ONE matmul, ReLU ----
    o_ref[...] = jnp.maximum(
        jnp.dot(wf_ref[...], tb_ref[...], preferred_element_type=jnp.float32),
        0.0).astype(o_ref.dtype)


# ----------------------------------------------------------------------------
# Wrapper: BN folding + batch-block-diagonal weight packing + pallas_call.
# Input / weights in PyTorch layouts.
# ----------------------------------------------------------------------------
def resnet_basicblock_pallas(x, conv_a_w, bn_a, conv_b_w, bn_b, down_w, eps=1e-5):
    """x: (N, Cin, H, W);  conv_a_w: (Cout, Cin, 3, 3);  conv_b_w: (Cout, Cout, 3, 3);
    down_w: (Cout, Cin, 1, 1);  bn_a / bn_b: (gamma, beta, running_mean, running_var)."""
    n, cin, h, w = x.shape
    cout = conv_a_w.shape[0]
    assert cout == 2 * cin and h % 2 == 0 and w % 2 == 0
    ho, wo = h // 2, w // 2
    s_in, s_out = h * w, ho * wo
    m_rows = n * cout

    # Host-cached constant matrices (constant-folded under jit).
    ga = _conv3x3_gather_mats(h, w, ho, wo, 2, 1)     # (9, s_in, s_out)
    gb = _conv3x3_gather_mats(ho, wo, ho, wo, 1, 1)   # (9, s_out, s_out)
    gp = _avgpool2x2_mat(h, w)                        # (s_in, s_out)

    def fold_bn(wconv, bn):
        gamma, beta, mean, var = bn
        scale = gamma / jnp.sqrt(var + eps)
        co, ci, kh, kw = wconv.shape
        w_taps = jnp.transpose(wconv * scale[:, None, None, None],
                               (2, 3, 0, 1)).reshape(kh * kw, co, ci)
        bias = beta - mean * scale
        return w_taps.astype(jnp.float32), bias.astype(jnp.float32)

    wa_t, ba = fold_bn(conv_a_w, bn_a)                # (9, Cout, Cin), (Cout,)
    wb_t, bb = fold_bn(conv_b_w, bn_b)                # (9, Cout, Cout), (Cout,)
    wd = down_w.reshape(cout, cin).astype(jnp.float32)

    eye_n = jnp.eye(n, dtype=jnp.float32)

    # conv_a combined weight: rows = (n, cout); cols = (tap, n, cin) + bias + pad
    wa_blk = jnp.einsum('nm,toi->notmi', eye_n, wa_t).reshape(m_rows, 9 * n * cin)
    ka_used = 9 * n * cin + 1
    ka = _round_up(ka_used, 8)
    wa_big = jnp.concatenate(
        [wa_blk, jnp.tile(ba, (n,))[:, None],
         jnp.zeros((m_rows, ka - ka_used), jnp.float32)], axis=1)      # (M, Ka)

    # final combined weight: conv_b taps | downsample 1x1 | bias | pad
    wb_blk = jnp.einsum('nm,toi->notmi', eye_n, wb_t).reshape(m_rows, 9 * n * cout)
    wd_blk = jnp.einsum('nm,oi->nomi', eye_n, wd).reshape(m_rows, n * cin)
    kb_used = 9 * n * cout + n * cin + 1
    kb = _round_up(kb_used, 8)
    wf_big = jnp.concatenate(
        [wb_blk, wd_blk, jnp.tile(bb, (n,))[:, None],
         jnp.zeros((m_rows, kb - kb_used), jnp.float32)], axis=1)      # (M, Kb)

    # Free, contiguous reshape: batch*channels on sublanes, spatial on lanes.
    x2d = x.reshape(n * cin, s_in).astype(jnp.float32)

    flops = 2 * (9 * n * cin * s_in * s_out          # conv_a gathers
                 + m_rows * ka * s_out               # conv_a weight matmul
                 + 9 * m_rows * s_out * s_out        # conv_b gathers
                 + n * cin * s_in * s_out            # avg-pool matmul
                 + m_rows * kb * s_out)              # final fused matmul
    bytes_accessed = 4 * (x2d.size + ga.size + gb.size + gp.size
                          + wa_big.size + wf_big.size + m_rows * s_out)

    out2d = pl.pallas_call(
        basicblock_kernel,
        out_shape=jax.ShapeDtypeStruct((m_rows, s_out), x.dtype),
        in_specs=[pl.BlockSpec(memory_space=pltpu.MemorySpace.VMEM)] * 6,
        out_specs=pl.BlockSpec(memory_space=pltpu.MemorySpace.VMEM),
        scratch_shapes=[pltpu.VMEM((ka, s_out), jnp.float32),
                        pltpu.VMEM((kb, s_out), jnp.float32)],
        cost_estimate=pl.CostEstimate(flops=flops, transcendentals=0,
                                      bytes_accessed=bytes_accessed),
    )(x2d, ga, gp, gb, wa_big, wf_big)

    # Free reshape back to NCHW (no transpose).
    return out2d.reshape(n, cout, ho, wo)


# ----------------------------------------------------------------------------
# Pure-JAX reference (eval-mode BN), for correctness checking.
# ----------------------------------------------------------------------------
def resnet_basicblock_reference(x, conv_a_w, bn_a, conv_b_w, bn_b, down_w, eps=1e-5):
    hi = jax.lax.Precision.HIGHEST

    def conv(v, wgt, stride, pad):
        return jax.lax.conv_general_dilated(
            v, wgt, window_strides=(stride, stride),
            padding=((pad, pad), (pad, pad)),
            dimension_numbers=("NCHW", "OIHW", "NCHW"),
            precision=hi)

    def bn(v, p):
        gamma, beta, mean, var = p
        s = gamma / jnp.sqrt(var + eps)
        return v * s[None, :, None, None] + (beta - mean * s)[None, :, None, None]

    a = jax.nn.relu(bn(conv(x, conv_a_w, 2, 1), bn_a))
    b = bn(conv(a, conv_b_w, 1, 1), bn_b)
    n, c, h, w = x.shape
    pooled = x.reshape(n, c, h // 2, 2, w // 2, 2).mean(axis=(3, 5))
    resid = conv(pooled, down_w, 1, 0)
    return jax.nn.relu(b + resid)


if __name__ == "__main__":
    key = jax.random.PRNGKey(0)
    ks = jax.random.split(key, 12)

    # ResNetBasicblock(inplanes=4, planes=8, stride=2) on a (2, 4, 16, 16) input.
    N, C_IN, H, W = 2, 4, 16, 16
    C_OUT = 2 * C_IN

    x = jax.random.normal(ks[0], (N, C_IN, H, W), dtype=jnp.float32)
    conv_a_w = jax.random.normal(ks[1], (C_OUT, C_IN, 3, 3), jnp.float32) * 0.2
    conv_b_w = jax.random.normal(ks[2], (C_OUT, C_OUT, 3, 3), jnp.float32) * 0.2
    down_w = jax.random.normal(ks[3], (C_OUT, C_IN, 1, 1), jnp.float32) * 0.3
    bn_a = (jax.random.uniform(ks[4], (C_OUT,), jnp.float32, 0.5, 1.5),
            jax.random.normal(ks[5], (C_OUT,), jnp.float32) * 0.1,
            jax.random.normal(ks[6], (C_OUT,), jnp.float32) * 0.1,
            jax.random.uniform(ks[7], (C_OUT,), jnp.float32, 0.5, 1.5))
    bn_b = (jax.random.uniform(ks[8], (C_OUT,), jnp.float32, 0.5, 1.5),
            jax.random.normal(ks[9], (C_OUT,), jnp.float32) * 0.1,
            jax.random.normal(ks[10], (C_OUT,), jnp.float32) * 0.1,
            jax.random.uniform(ks[11], (C_OUT,), jnp.float32, 0.5, 1.5))

    fwd = jax.jit(resnet_basicblock_pallas)
    out = jax.block_until_ready(fwd(x, conv_a_w, bn_a, conv_b_w, bn_b, down_w))

    ref = resnet_basicblock_reference(x, conv_a_w, bn_a, conv_b_w, bn_b, down_w)
    assert out.shape == (N, C_OUT, H // 2, W // 2)
    err = float(jnp.max(jnp.abs(out - ref)))
    assert jnp.allclose(out, ref, atol=2e-4, rtol=2e-4), f"max abs err {err}"

    print("KERNEL_OK")
</pallas_src>

<mosaic_0001>
module attributes {stable_mosaic.version = 11 : i64} {
  func.func @basicblock_kernel(%arg0: memref<8x256xf32, #tpu.memory_space<vmem>>, %arg1: memref<9x256x64xf32, #tpu.memory_space<vmem>>, %arg2: memref<256x64xf32, #tpu.memory_space<vmem>>, %arg3: memref<9x64x64xf32, #tpu.memory_space<vmem>>, %arg4: memref<16x80xf32, #tpu.memory_space<vmem>>, %arg5: memref<16x160xf32, #tpu.memory_space<vmem>>, %arg6: memref<16x64xf32, #tpu.memory_space<vmem>>, %arg7: memref<80x64xf32, #tpu.memory_space<vmem>>, %arg8: memref<160x64xf32, #tpu.memory_space<vmem>>) attributes {dimension_semantics = [], scalar_prefetch = 0 : i64, scratch_operands = 2 : i64, tpu.core_type = #tpu.core_type<tc>} {
    %c0 = arith.constant 0 : index
    %c0_0 = arith.constant 0 : index
    %0 = vector.load %arg0[%c0, %c0_0] : memref<8x256xf32, #tpu.memory_space<vmem>>, vector<8x256xf32>
    %c0_1 = arith.constant 0 : index
    %c0_2 = arith.constant 0 : index
    %c0_3 = arith.constant 0 : index
    %1 = vector.load %arg1[%c0_1, %c0_2, %c0_3] : memref<9x256x64xf32, #tpu.memory_space<vmem>>, vector<1x256x64xf32>
    %2 = vector.shape_cast %1 : vector<1x256x64xf32> to vector<256x64xf32>
    %cst = arith.constant dense<0.000000e+00> : vector<8x64xf32>
    %3 = tpu.matmul %0, %2, %cst {dimension_numbers = #tpu.dot_dimension_numbers<[1], [0], [0], [1], [0, 0, 1, 1], [], []>} : vector<8x256xf32>, vector<256x64xf32>, vector<8x64xf32> -> vector<8x64xf32>
    %c0_4 = arith.constant 0 : index
    %c0_5 = arith.constant 0 : index
    %4 = vector.load %arg7[%c0_4, %c0_5] : memref<80x64xf32, #tpu.memory_space<vmem>>, vector<8x64xf32>
    tpu.vector_store %arg7[%c0_4, %c0_5], %3 {strides = array<i32>} : memref<80x64xf32, #tpu.memory_space<vmem>>, vector<8x64xf32>,
    %c1 = arith.constant 1 : index
    %c0_6 = arith.constant 0 : index
    %c0_7 = arith.constant 0 : index
    %5 = vector.load %arg1[%c1, %c0_6, %c0_7] : memref<9x256x64xf32, #tpu.memory_space<vmem>>, vector<1x256x64xf32>
    %6 = vector.shape_cast %5 : vector<1x256x64xf32> to vector<256x64xf32>
    %cst_8 = arith.constant dense<0.000000e+00> : vector<8x64xf32>
    %7 = tpu.matmul %0, %6, %cst_8 {dimension_numbers = #tpu.dot_dimension_numbers<[1], [0], [0], [1], [0, 0, 1, 1], [], []>} : vector<8x256xf32>, vector<256x64xf32>, vector<8x64xf32> -> vector<8x64xf32>
    %c8 = arith.constant 8 : index
    %c0_9 = arith.constant 0 : index
    %8 = vector.load %arg7[%c8, %c0_9] : memref<80x64xf32, #tpu.memory_space<vmem>>, vector<8x64xf32>
    tpu.vector_store %arg7[%c8, %c0_9], %7 {strides = array<i32>} : memref<80x64xf32, #tpu.memory_space<vmem>>, vector<8x64xf32>,
    %c2 = arith.constant 2 : index
    %c0_10 = arith.constant 0 : index
    %c0_11 = arith.constant 0 : index
    %9 = vector.load %arg1[%c2, %c0_10, %c0_11] : memref<9x256x64xf32, #tpu.memory_space<vmem>>, vector<1x256x64xf32>
    %10 = vector.shape_cast %9 : vector<1x256x64xf32> to vector<256x64xf32>
    %cst_12 = arith.constant dense<0.000000e+00> : vector<8x64xf32>
    %11 = tpu.matmul %0, %10, %cst_12 {dimension_numbers = #tpu.dot_dimension_numbers<[1], [0], [0], [1], [0, 0, 1, 1], [], []>} : vector<8x256xf32>, vector<256x64xf32>, vector<8x64xf32> -> vector<8x64xf32>
    %c16 = arith.constant 16 : index
    %c0_13 = arith.constant 0 : index
    %12 = vector.load %arg7[%c16, %c0_13] : memref<80x64xf32, #tpu.memory_space<vmem>>, vector<8x64xf32>
    tpu.vector_store %arg7[%c16, %c0_13], %11 {strides = array<i32>} : memref<80x64xf32, #tpu.memory_space<vmem>>, vector<8x64xf32>,
    %c3 = arith.constant 3 : index
    %c0_14 = arith.constant 0 : index
    %c0_15 = arith.constant 0 : index
    %13 = vector.load %arg1[%c3, %c0_14, %c0_15] : memref<9x256x64xf32, #tpu.memory_space<vmem>>, vector<1x256x64xf32>
    %14 = vector.shape_cast %13 : vector<1x256x64xf32> to vector<256x64xf32>
    %cst_16 = arith.constant dense<0.000000e+00> : vector<8x64xf32>
    %15 = tpu.matmul %0, %14, %cst_16 {dimension_numbers = #tpu.dot_dimension_numbers<[1], [0], [0], [1], [0, 0, 1, 1], [], []>} : vector<8x256xf32>, vector<256x64xf32>, vector<8x64xf32> -> vector<8x64xf32>
    %c24 = arith.constant 24 : index
    %c0_17 = arith.constant 0 : index
    %16 = vector.load %arg7[%c24, %c0_17] : memref<80x64xf32, #tpu.memory_space<vmem>>, vector<8x64xf32>
    tpu.vector_store %arg7[%c24, %c0_17], %15 {strides = array<i32>} : memref<80x64xf32, #tpu.memory_space<vmem>>, vector<8x64xf32>,
    %c4 = arith.constant 4 : index
    %c0_18 = arith.constant 0 : index
    %c0_19 = arith.constant 0 : index
    %17 = vector.load %arg1[%c4, %c0_18, %c0_19] : memref<9x256x64xf32, #tpu.memory_space<vmem>>, vector<1x256x64xf32>
    %18 = vector.shape_cast %17 : vector<1x256x64xf32> to vector<256x64xf32>
    %cst_20 = arith.constant dense<0.000000e+00> : vector<8x64xf32>
    %19 = tpu.matmul %0, %18, %cst_20 {dimension_numbers = #tpu.dot_dimension_numbers<[1], [0], [0], [1], [0, 0, 1, 1], [], []>} : vector<8x256xf32>, vector<256x64xf32>, vector<8x64xf32> -> vector<8x64xf32>
    %c32 = arith.constant 32 : index
    %c0_21 = arith.constant 0 : index
    %20 = vector.load %arg7[%c32, %c0_21] : memref<80x64xf32, #tpu.memory_space<vmem>>, vector<8x64xf32>
    tpu.vector_store %arg7[%c32, %c0_21], %19 {strides = array<i32>} : memref<80x64xf32, #tpu.memory_space<vmem>>, vector<8x64xf32>,
    %c5 = arith.constant 5 : index
    %c0_22 = arith.constant 0 : index
    %c0_23 = arith.constant 0 : index
    %21 = vector.load %arg1[%c5, %c0_22, %c0_23] : memref<9x256x64xf32, #tpu.memory_space<vmem>>, vector<1x256x64xf32>
    %22 = vector.shape_cast %21 : vector<1x256x64xf32> to vector<256x64xf32>
    %cst_24 = arith.constant dense<0.000000e+00> : vector<8x64xf32>
    %23 = tpu.matmul %0, %22, %cst_24 {dimension_numbers = #tpu.dot_dimension_numbers<[1], [0], [0], [1], [0, 0, 1, 1], [], []>} : vector<8x256xf32>, vector<256x64xf32>, vector<8x64xf32> -> vector<8x64xf32>
    %c40 = arith.constant 40 : index
    %c0_25 = arith.constant 0 : index
    %24 = vector.load %arg7[%c40, %c0_25] : memref<80x64xf32, #tpu.memory_space<vmem>>, vector<8x64xf32>
    tpu.vector_store %arg7[%c40, %c0_25], %23 {strides = array<i32>} : memref<80x64xf32, #tpu.memory_space<vmem>>, vector<8x64xf32>,
    %c6 = arith.constant 6 : index
    %c0_26 = arith.constant 0 : index
    %c0_27 = arith.constant 0 : index
    %25 = vector.load %arg1[%c6, %c0_26, %c0_27] : memref<9x256x64xf32, #tpu.memory_space<vmem>>, vector<1x256x64xf32>
    %26 = vector.shape_cast %25 : vector<1x256x64xf32> to vector<256x64xf32>
    %cst_28 = arith.constant dense<0.000000e+00> : vector<8x64xf32>
    %27 = tpu.matmul %0, %26, %cst_28 {dimension_numbers = #tpu.dot_dimension_numbers<[1], [0], [0], [1], [0, 0, 1, 1], [], []>} : vector<8x256xf32>, vector<256x64xf32>, vector<8x64xf32> -> vector<8x64xf32>
    %c48 = arith.constant 48 : index
    %c0_29 = arith.constant 0 : index
    %28 = vector.load %arg7[%c48, %c0_29] : memref<80x64xf32, #tpu.memory_space<vmem>>, vector<8x64xf32>
    tpu.vector_store %arg7[%c48, %c0_29], %27 {strides = array<i32>} : memref<80x64xf32, #tpu.memory_space<vmem>>, vector<8x64xf32>,
    %c7 = arith.constant 7 : index
    %c0_30 = arith.constant 0 : index
    %c0_31 = arith.constant 0 : index
    %29 = vector.load %arg1[%c7, %c0_30, %c0_31] : memref<9x256x64xf32, #tpu.memory_space<vmem>>, vector<1x256x64xf32>
    %30 = vector.shape_cast %29 : vector<1x256x64xf32> to vector<256x64xf32>
    %cst_32 = arith.constant dense<0.000000e+00> : vector<8x64xf32>
    %31 = tpu.matmul %0, %30, %cst_32 {dimension_numbers = #tpu.dot_dimension_numbers<[1], [0], [0], [1], [0, 0, 1, 1], [], []>} : vector<8x256xf32>, vector<256x64xf32>, vector<8x64xf32> -> vector<8x64xf32>
    %c56 = arith.constant 56 : index
    %c0_33 = arith.constant 0 : index
    %32 = vector.load %arg7[%c56, %c0_33] : memref<80x64xf32, #tpu.memory_space<vmem>>, vector<8x64xf32>
    tpu.vector_store %arg7[%c56, %c0_33], %31 {strides = array<i32>} : memref<80x64xf32, #tpu.memory_space<vmem>>, vector<8x64xf32>,
    %c8_34 = arith.constant 8 : index
    %c0_35 = arith.constant 0 : index
    %c0_36 = arith.constant 0 : index
    %33 = vector.load %arg1[%c8_34, %c0_35, %c0_36] : memref<9x256x64xf32, #tpu.memory_space<vmem>>, vector<1x256x64xf32>
    %34 = vector.shape_cast %33 : vector<1x256x64xf32> to vector<256x64xf32>
    %cst_37 = arith.constant dense<0.000000e+00> : vector<8x64xf32>
    %35 = tpu.matmul %0, %34, %cst_37 {dimension_numbers = #tpu.dot_dimension_numbers<[1], [0], [0], [1], [0, 0, 1, 1], [], []>} : vector<8x256xf32>, vector<256x64xf32>, vector<8x64xf32> -> vector<8x64xf32>
    %c64 = arith.constant 64 : index
    %c0_38 = arith.constant 0 : index
    %36 = vector.load %arg7[%c64, %c0_38] : memref<80x64xf32, #tpu.memory_space<vmem>>, vector<8x64xf32>
    tpu.vector_store %arg7[%c64, %c0_38], %35 {strides = array<i32>} : memref<80x64xf32, #tpu.memory_space<vmem>>, vector<8x64xf32>,
    %37 = tpu.iota {dimensions = array<i32: 0>} : vector<8x64xi32>
    %c0_i32 = arith.constant 0 : i32
    %38 = vector.broadcast %c0_i32 : i32 to vector<8x64xi32>
    %39 = arith.cmpi eq, %37, %38 : vector<8x64xi32>
    %cst_39 = arith.constant 1.000000e+00 : f32
    %cst_40 = arith.constant 0.000000e+00 : f32
    %40 = vector.broadcast %cst_39 : f32 to vector<8x64xf32>
    %41 = vector.broadcast %cst_40 : f32 to vector<8x64xf32>
    %42 = arith.select %39, %40, %41 : vector<8x64xi1>, vector<8x64xf32>
    %c72 = arith.constant 72 : index
    %c0_41 = arith.constant 0 : index
    %43 = vector.load %arg7[%c72, %c0_41] : memref<80x64xf32, #tpu.memory_space<vmem>>, vector<8x64xf32>
    tpu.vector_store %arg7[%c72, %c0_41], %42 {strides = array<i32>} : memref<80x64xf32, #tpu.memory_space<vmem>>, vector<8x64xf32>,
    %c0_42 = arith.constant 0 : index
    %c0_43 = arith.constant 0 : index
    %44 = vector.load %arg4[%c0_42, %c0_43] : memref<16x80xf32, #tpu.memory_space<vmem>>, vector<16x80xf32>
    %c0_44 = arith.constant 0 : index
    %c0_45 = arith.constant 0 : index
    %45 = vector.load %arg7[%c0_44, %c0_45] : memref<80x64xf32, #tpu.memory_space<vmem>>, vector<80x64xf32>
    %cst_46 = arith.constant dense<0.000000e+00> : vector<16x64xf32>
    %46 = tpu.matmul %44, %45, %cst_46 {dimension_numbers = #tpu.dot_dimension_numbers<[1], [0], [0], [1], [0, 0, 1, 1], [], []>} : vector<16x80xf32>, vector<80x64xf32>, vector<16x64xf32> -> vector<16x64xf32>
    %cst_47 = arith.constant 0.000000e+00 : f32
    %47 = vector.broadcast %cst_47 : f32 to vector<16x64xf32>
    %48 = arith.maximumf %46, %47 : vector<16x64xf32>
    %c0_48 = arith.constant 0 : index
    %c0_49 = arith.constant 0 : index
    %c0_50 = arith.constant 0 : index
    %49 = vector.load %arg3[%c0_48, %c0_49, %c0_50] : memref<9x64x64xf32, #tpu.memory_space<vmem>>, vector<1x64x64xf32>
    %50 = vector.shape_cast %49 : vector<1x64x64xf32> to vector<64x64xf32>
    %cst_51 = arith.constant dense<0.000000e+00> : vector<16x64xf32>
    %51 = tpu.matmul %48, %50, %cst_51 {dimension_numbers = #tpu.dot_dimension_numbers<[1], [0], [0], [1], [0, 0, 1, 1], [], []>} : vector<16x64xf32>, vector<64x64xf32>, vector<16x64xf32> -> vector<16x64xf32>
    %c0_52 = arith.constant 0 : index
    %c0_53 = arith.constant 0 : index
    %52 = vector.load %arg8[%c0_52, %c0_53] : memref<160x64xf32, #tpu.memory_space<vmem>>, vector<16x64xf32>
    tpu.vector_store %arg8[%c0_52, %c0_53], %51 {strides = array<i32>} : memref<160x64xf32, #tpu.memory_space<vmem>>, vector<16x64xf32>,
    %c1_54 = arith.constant 1 : index
    %c0_55 = arith.constant 0 : index
    %c0_56 = arith.constant 0 : index
    %53 = vector.load %arg3[%c1_54, %c0_55, %c0_56] : memref<9x64x64xf32, #tpu.memory_space<vmem>>, vector<1x64x64xf32>
    %54 = vector.shape_cast %53 : vector<1x64x64xf32> to vector<64x64xf32>
    %cst_57 = arith.constant dense<0.000000e+00> : vector<16x64xf32>
    %55 = tpu.matmul %48, %54, %cst_57 {dimension_numbers = #tpu.dot_dimension_numbers<[1], [0], [0], [1], [0, 0, 1, 1], [], []>} : vector<16x64xf32>, vector<64x64xf32>, vector<16x64xf32> -> vector<16x64xf32>
    %c16_58 = arith.constant 16 : index
    %c0_59 = arith.constant 0 : index
    %56 = vector.load %arg8[%c16_58, %c0_59] : memref<160x64xf32, #tpu.memory_space<vmem>>, vector<16x64xf32>
    tpu.vector_store %arg8[%c16_58, %c0_59], %55 {strides = array<i32>} : memref<160x64xf32, #tpu.memory_space<vmem>>, vector<16x64xf32>,
    %c2_60 = arith.constant 2 : index
    %c0_61 = arith.constant 0 : index
    %c0_62 = arith.constant 0 : index
    %57 = vector.load %arg3[%c2_60, %c0_61, %c0_62] : memref<9x64x64xf32, #tpu.memory_space<vmem>>, vector<1x64x64xf32>
    %58 = vector.shape_cast %57 : vector<1x64x64xf32> to vector<64x64xf32>
    %cst_63 = arith.constant dense<0.000000e+00> : vector<16x64xf32>
    %59 = tpu.matmul %48, %58, %cst_63 {dimension_numbers = #tpu.dot_dimension_numbers<[1], [0], [0], [1], [0, 0, 1, 1], [], []>} : vector<16x64xf32>, vector<64x64xf32>, vector<16x64xf32> -> vector<16x64xf32>
    %c32_64 = arith.constant 32 : index
    %c0_65 = arith.constant 0 : index
    %60 = vector.load %arg8[%c32_64, %c0_65] : memref<160x64xf32, #tpu.memory_space<vmem>>, vector<16x64xf32>
    tpu.vector_store %arg8[%c32_64, %c0_65], %59 {strides = array<i32>} : memref<160x64xf32, #tpu.memory_space<vmem>>, vector<16x64xf32>,
    %c3_66 = arith.constant 3 : index
    %c0_67 = arith.constant 0 : index
    %c0_68 = arith.constant 0 : index
    %61 = vector.load %arg3[%c3_66, %c0_67, %c0_68] : memref<9x64x64xf32, #tpu.memory_space<vmem>>, vector<1x64x64xf32>
    %62 = vector.shape_cast %61 : vector<1x64x64xf32> to vector<64x64xf32>
    %cst_69 = arith.constant dense<0.000000e+00> : vector<16x64xf32>
    %63 = tpu.matmul %48, %62, %cst_69 {dimension_numbers = #tpu.dot_dimension_numbers<[1], [0], [0], [1], [0, 0, 1, 1], [], []>} : vector<16x64xf32>, vector<64x64xf32>, vector<16x64xf32> -> vector<16x64xf32>
    %c48_70 = arith.constant 48 : index
    %c0_71 = arith.constant 0 : index
    %64 = vector.load %arg8[%c48_70, %c0_71] : memref<160x64xf32, #tpu.memory_space<vmem>>, vector<16x64xf32>
    tpu.vector_store %arg8[%c48_70, %c0_71], %63 {strides = array<i32>} : memref<160x64xf32, #tpu.memory_space<vmem>>, vector<16x64xf32>,
    %c4_72 = arith.constant 4 : index
    %c0_73 = arith.constant 0 : index
    %c0_74 = arith.constant 0 : index
    %65 = vector.load %arg3[%c4_72, %c0_73, %c0_74] : memref<9x64x64xf32, #tpu.memory_space<vmem>>, vector<1x64x64xf32>
    %66 = vector.shape_cast %65 : vector<1x64x64xf32> to vector<64x64xf32>
    %cst_75 = arith.constant dense<0.000000e+00> : vector<16x64xf32>
    %67 = tpu.matmul %48, %66, %cst_75 {dimension_numbers = #tpu.dot_dimension_numbers<[1], [0], [0], [1], [0, 0, 1, 1], [], []>} : vector<16x64xf32>, vector<64x64xf32>, vector<16x64xf32> -> vector<16x64xf32>
    %c64_76 = arith.constant 64 : index
    %c0_77 = arith.constant 0 : index
    %68 = vector.load %arg8[%c64_76, %c0_77] : memref<160x64xf32, #tpu.memory_space<vmem>>, vector<16x64xf32>
    tpu.vector_store %arg8[%c64_76, %c0_77], %67 {strides = array<i32>} : memref<160x64xf32, #tpu.memory_space<vmem>>, vector<16x64xf32>,
    %c5_78 = arith.constant 5 : index
    %c0_79 = arith.constant 0 : index
    %c0_80 = arith.constant 0 : index
    %69 = vector.load %arg3[%c5_78, %c0_79, %c0_80] : memref<9x64x64xf32, #tpu.memory_space<vmem>>, vector<1x64x64xf32>
    %70 = vector.shape_cast %69 : vector<1x64x64xf32> to vector<64x64xf32>
    %cst_81 = arith.constant dense<0.000000e+00> : vector<16x64xf32>
    %71 = tpu.matmul %48, %70, %cst_81 {dimension_numbers = #tpu.dot_dimension_numbers<[1], [0], [0], [1], [0, 0, 1, 1], [], []>} : vector<16x64xf32>, vector<64x64xf32>, vector<16x64xf32> -> vector<16x64xf32>
    %c80 = arith.constant 80 : index
    %c0_82 = arith.constant 0 : index
    %72 = vector.load %arg8[%c80, %c0_82] : memref<160x64xf32, #tpu.memory_space<vmem>>, vector<16x64xf32>
    tpu.vector_store %arg8[%c80, %c0_82], %71 {strides = array<i32>} : memref<160x64xf32, #tpu.memory_space<vmem>>, vector<16x64xf32>,
    %c6_83 = arith.constant 6 : index
    %c0_84 = arith.constant 0 : index
    %c0_85 = arith.constant 0 : index
    %73 = vector.load %arg3[%c6_83, %c0_84, %c0_85] : memref<9x64x64xf32, #tpu.memory_space<vmem>>, vector<1x64x64xf32>
    %74 = vector.shape_cast %73 : vector<1x64x64xf32> to vector<64x64xf32>
    %cst_86 = arith.constant dense<0.000000e+00> : vector<16x64xf32>
    %75 = tpu.matmul %48, %74, %cst_86 {dimension_numbers = #tpu.dot_dimension_numbers<[1], [0], [0], [1], [0, 0, 1, 1], [], []>} : vector<16x64xf32>, vector<64x64xf32>, vector<16x64xf32> -> vector<16x64xf32>
    %c96 = arith.constant 96 : index
    %c0_87 = arith.constant 0 : index
    %76 = vector.load %arg8[%c96, %c0_87] : memref<160x64xf32, #tpu.memory_space<vmem>>, vector<16x64xf32>
    tpu.vector_store %arg8[%c96, %c0_87], %75 {strides = array<i32>} : memref<160x64xf32, #tpu.memory_space<vmem>>, vector<16x64xf32>,
    %c7_88 = arith.constant 7 : index
    %c0_89 = arith.constant 0 : index
    %c0_90 = arith.constant 0 : index
    %77 = vector.load %arg3[%c7_88, %c0_89, %c0_90] : memref<9x64x64xf32, #tpu.memory_space<vmem>>, vector<1x64x64xf32>
    %78 = vector.shape_cast %77 : vector<1x64x64xf32> to vector<64x64xf32>
    %cst_91 = arith.constant dense<0.000000e+00> : vector<16x64xf32>
    %79 = tpu.matmul %48, %78, %cst_91 {dimension_numbers = #tpu.dot_dimension_numbers<[1], [0], [0], [1], [0, 0, 1, 1], [], []>} : vector<16x64xf32>, vector<64x64xf32>, vector<16x64xf32> -> vector<16x64xf32>
    %c112 = arith.constant 112 : index
    %c0_92 = arith.constant 0 : index
    %80 = vector.load %arg8[%c112, %c0_92] : memref<160x64xf32, #tpu.memory_space<vmem>>, vector<16x64xf32>
    tpu.vector_store %arg8[%c112, %c0_92], %79 {strides = array<i32>} : memref<160x64xf32, #tpu.memory_space<vmem>>, vector<16x64xf32>,
    %c8_93 = arith.constant 8 : index
    %c0_94 = arith.constant 0 : index
    %c0_95 = arith.constant 0 : index
    %81 = vector.load %arg3[%c8_93, %c0_94, %c0_95] : memref<9x64x64xf32, #tpu.memory_space<vmem>>, vector<1x64x64xf32>
    %82 = vector.shape_cast %81 : vector<1x64x64xf32> to vector<64x64xf32>
    %cst_96 = arith.constant dense<0.000000e+00> : vector<16x64xf32>
    %83 = tpu.matmul %48, %82, %cst_96 {dimension_numbers = #tpu.dot_dimension_numbers<[1], [0], [0], [1], [0, 0, 1, 1], [], []>} : vector<16x64xf32>, vector<64x64xf32>, vector<16x64xf32> -> vector<16x64xf32>
    %c128 = arith.constant 128 : index
    %c0_97 = arith.constant 0 : index
    %84 = vector.load %arg8[%c128, %c0_97] : memref<160x64xf32, #tpu.memory_space<vmem>>, vector<16x64xf32>
    tpu.vector_store %arg8[%c128, %c0_97], %83 {strides = array<i32>} : memref<160x64xf32, #tpu.memory_space<vmem>>, vector<16x64xf32>,
    %c0_98 = arith.constant 0 : index
    %c0_99 = arith.constant 0 : index
    %85 = vector.load %arg2[%c0_98, %c0_99] : memref<256x64xf32, #tpu.memory_space<vmem>>, vector<256x64xf32>
    %cst_100 = arith.constant dense<0.000000e+00> : vector<8x64xf32>
    %86 = tpu.matmul %0, %85, %cst_100 {dimension_numbers = #tpu.dot_dimension_numbers<[1], [0], [0], [1], [0, 0, 1, 1], [], []>} : vector<8x256xf32>, vector<256x64xf32>, vector<8x64xf32> -> vector<8x64xf32>
    %c144 = arith.constant 144 : index
    %c0_101 = arith.constant 0 : index
    %87 = vector.load %arg8[%c144, %c0_101] : memref<160x64xf32, #tpu.memory_space<vmem>>, vector<8x64xf32>
    tpu.vector_store %arg8[%c144, %c0_101], %86 {strides = array<i32>} : memref<160x64xf32, #tpu.memory_space<vmem>>, vector<8x64xf32>,
    %88 = tpu.iota {dimensions = array<i32: 0>} : vector<8x64xi32>
    %c0_i32_102 = arith.constant 0 : i32
    %89 = vector.broadcast %c0_i32_102 : i32 to vector<8x64xi32>
    %90 = arith.cmpi eq, %88, %89 : vector<8x64xi32>
    %cst_103 = arith.constant 1.000000e+00 : f32
    %cst_104 = arith.constant 0.000000e+00 : f32
    %91 = vector.broadcast %cst_103 : f32 to vector<8x64xf32>
    %92 = vector.broadcast %cst_104 : f32 to vector<8x64xf32>
    %93 = arith.select %90, %91, %92 : vector<8x64xi1>, vector<8x64xf32>
    %c152 = arith.constant 152 : index
    %c0_105 = arith.constant 0 : index
    %94 = vector.load %arg8[%c152, %c0_105] : memref<160x64xf32, #tpu.memory_space<vmem>>, vector<8x64xf32>
    tpu.vector_store %arg8[%c152, %c0_105], %93 {strides = array<i32>} : memref<160x64xf32, #tpu.memory_space<vmem>>, vector<8x64xf32>,
    %c0_106 = arith.constant 0 : index
    %c0_107 = arith.constant 0 : index
    %95 = vector.load %arg5[%c0_106, %c0_107] : memref<16x160xf32, #tpu.memory_space<vmem>>, vector<16x160xf32>
    %c0_108 = arith.constant 0 : index
    %c0_109 = arith.constant 0 : index
    %96 = vector.load %arg8[%c0_108, %c0_109] : memref<160x64xf32, #tpu.memory_space<vmem>>, vector<160x64xf32>
    %cst_110 = arith.constant dense<0.000000e+00> : vector<16x64xf32>
    %97 = tpu.matmul %95, %96, %cst_110 {dimension_numbers = #tpu.dot_dimension_numbers<[1], [0], [0], [1], [0, 0, 1, 1], [], []>} : vector<16x160xf32>, vector<160x64xf32>, vector<16x64xf32> -> vector<16x64xf32>
    %cst_111 = arith.constant 0.000000e+00 : f32
    %98 = vector.broadcast %cst_111 : f32 to vector<16x64xf32>
    %99 = arith.maximumf %97, %98 : vector<16x64xf32>
    %c0_112 = arith.constant 0 : index
    %c0_113 = arith.constant 0 : index
    %100 = vector.load %arg6[%c0_112, %c0_113] : memref<16x64xf32, #tpu.memory_space<vmem>>, vector<16x64xf32>
    tpu.vector_store %arg6[%c0_112, %c0_113], %99 {strides = array<i32>} : memref<16x64xf32, #tpu.memory_space<vmem>>, vector<16x64xf32>,
    return
  }
}

</mosaic_0001>

<bundles_post_ra>
// kernel: tile.18
= control target key start
LH: loop header
LB: loop body
LE: loop exit
PB: predicated region body
PF: predicated region fallthrough
CT: control target
= control target key end

     0   :  { %s22_s0 = inlined_call_operand.vmem [shape: f32[8], index: 0, kind: input, shape index: {}]   ;;  %s23_s1 = inlined_call_operand.vmem [shape: f32[2,8], index: 1, kind: output, shape index: {}]  }
   0x1   :  { %v4_v0 = vld [vmem:[%s22_s0] ss:$0 sm:$0xff] }
   0x2   :  { %5 = vst [vmem:[%s23_s1] sm:$0x3] %v4_v0 }

// kernel: tile.1
= control target key start
LH: loop header
LB: loop body
LE: loop exit
PB: predicated region body
PF: predicated region fallthrough
CT: control target
= control target key end

     0   :  { %s67_s8 = smov 125   ;;  %vm8_vm0 = vcmask 7168   ;;  %s68_s11 = smov 126   ;;  %s118_s0 = inlined_call_operand.vmem [shape: f32[2,8], index: 0, kind: input, shape index: {}]   ;;  %s119_s1 = inlined_call_operand.vmem [shape: f32[16,1], index: 1, kind: output, shape index: {}]  }
   0x1   :  { %v5_v0 = vld [vmem:[%s118_s0] sm:$0x3]  ;;  %s66_s0 = smov 127   ;;  %s69_s12 = smov 124  }
   0x2   :  { %6 = vst [vmem:[#allocation0] sm:$0x3] %v5_v0  ;;  %s70_s13 = smov 123   ;;  %s71_s14 = smov 122  }
   0x3   :  { %s72_s15 = smov 121  }
   0x9   :  { %v10_v1 = vld [vmem:[#allocation0] sm:$0x3]  }
   0xa   :  { %v22_v2 = vld [vmem:[#allocation0] sm:$0x3]   ;;  %11 = vrot.lane.b32.xlu0 %v10_v1, %s66_s0 }
   0xb   :  { %23 = vrot.lane.b32.xlu1 %v22_v2, %s67_s8  ;;  %v16_v3 = vld [vmem:[#allocation0] sm:$0x3]  }
   0xc   :  { %v28_v4 = vld [vmem:[#allocation0] sm:$0x3]  }
   0xd   :  { %v7_v5 = vld [vmem:[#allocation0] sm:$0x3]  }
   0xe   :  { %9 = vst.msk [vmem:[%s119_s1] ss:$8 sm:$0x3] %vm8_vm0, %v7_v5   ;;  %17 = vrot.lane.b32.xlu0 %v16_v3, %s68_s11  ;;  %v34_v6 = vld [vmem:[#allocation0] sm:$0x3]  }
   0xf   :  { %29 = vrot.lane.b32.xlu1 %v28_v4, %s69_s12  ;;  %v40_v7 = vld [vmem:[#allocation0] sm:$0x3]  }
  0x10   :  { %v46_v8 = vld [vmem:[#allocation0] sm:$0x3]  }
  0x12   :  { %35 = vrot.lane.b32.xlu0 %v34_v6, %s70_s13 }
  0x13   :  { %41 = vrot.lane.b32.xlu1 %v40_v7, %s71_s14 }
  0x16   :  { %47 = vrot.lane.b32.xlu0 %v46_v8, %s72_s15 }
  0x7c   :  { %v12_v9 = vpop.permute.xlu0 %11  }
  0x7d   :  { %v24_v10 = vpop.permute.xlu1 %23   ;;  %52 = vst.msk [vmem:[%s119_s1 + $0x1] ss:$8 sm:$0x3] %vm8_vm0, %v12_v9  }
  0x7e   :  { %54 = vst.msk [vmem:[%s119_s1 + $0x3] ss:$8 sm:$0x3] %vm8_vm0, %v24_v10  }
  0x80   :  { %v18_v11 = vpop.permute.xlu0 %17  }
  0x81   :  { %v30_v12 = vpop.permute.xlu1 %29   ;;  %53 = vst.msk [vmem:[%s119_s1 + $0x2] ss:$8 sm:$0x3] %vm8_vm0, %v18_v11  }
  0x82   :  { %55 = vst.msk [vmem:[%s119_s1 + $0x4] ss:$8 sm:$0x3] %vm8_vm0, %v30_v12  }
  0x84   :  { %v36_v13 = vpop.permute.xlu0 %35  }
  0x85   :  { %v42_v14 = vpop.permute.xlu1 %41   ;;  %56 = vst.msk [vmem:[%s119_s1 + $0x5] ss:$8 sm:$0x3] %vm8_vm0, %v36_v13  }
  0x86   :  { %57 = vst.msk [vmem:[%s119_s1 + $0x6] ss:$8 sm:$0x3] %vm8_vm0, %v42_v14  }
  0x88   :  { %v48_v15 = vpop.permute.xlu0 %47  }
  0x89   :  { %58 = vst.msk [vmem:[%s119_s1 + $0x7] ss:$8 sm:$0x3] %vm8_vm0, %v48_v15  }

// kernel: resnet_basicblock_pallas.1
= control target key start
LH: loop header
LB: loop body
LE: loop exit
PB: predicated region body
PF: predicated region fallthrough
CT: control target
= control target key end

     0   :  { %11 = vsyncpa [#allocation5], 0  ;;  %s2834_s21 = smov [#allocation4]   ;;  %s3346_s0 = inlined_call_operand.vmem [shape: f32[8,256], index: 0, kind: input, shape index: {}]   ;;  %s3347_s1 = inlined_call_operand.hbm [shape: f32[9,256,64], index: 1, kind: input, shape index: {}]   ;;  %s3348_s2 = inlined_call_operand.vmem [shape: f32[256,64], index: 2, kind: input, shape index: {}]   ;;  %s3349_s3 = inlined_call_operand.vmem [shape: f32[9,64,64], index: 3, kind: input, shape index: {}]   ;;  %s3350_s4 = inlined_call_operand.vmem [shape: f32[16,80], index: 4, kind: input, shape index: {}]   ;;  %s3351_s5 = inlined_call_operand.vmem [shape: f32[16,160], index: 5, kind: input, shape index: {}]   ;;  %s3352_s6 = inlined_call_operand.vmem [shape: f32[16,64], index: 6, kind: output, shape index: {}]  }
   0x1   :  { %s19_s22 = sshll.u32 %s2834_s21, 4  ;;  %s20_s22 = int_to_ptr.vmem [resolvable:$true] %s19_s22 }
   0x2   :  { %s2820_s23 = scalar_lea.vmem %s20_s22, 36864  ;;  %p2825_p1 = scmp.lt.s32.totalorder %s20_s22, %s20_s22 }
   0x3   :  { %p2821_p0 = scmp.ne.s32.totalorder %s20_s22, %s2820_s23  ;;  %p2826_p2 = scmp.lt.s32.totalorder %s2820_s23, %s2820_s23 }
   0x5   :  { %p2827_p3 = por %p2826_p2, %p2825_p1 }
   0x7   :  { %p2828_p4 = pnand %p2827_p3, %p2821_p0 }
   0x9   :  { %2831 = shalt.err (!%p2828_p4)
}
   0xa   :  { %s2835_s24 = smov 128   ;;  %s2836_s25 = smov 8  }
   0xb   :  { %25 = dma.hbm_to_vmem [thread:$0]  %s3347_s1, 36864, %s20_s22, [#allocation5], %s2835_s24, %s2835_s24, %s2836_s25  }
   0xc   :  { %2832 = dma.done.wait [#allocation5], 36864  }
   0xd   :  { %2833 = vsyncadd [#allocation5], 4294930432  ;;  %v70_v0 = vld [vmem:[#allocation4 + $0xf8] sm:$0xff]  ;;  %v69_v2 = vld [vmem:[#allocation4 + $0xf0] sm:$0xff]  ;;  %vm141_vm1 = vcmask 523264   ;;  %vm992_vm2 = vcmask 654336  }
   0xe   :  { %v54_v1 = vld [vmem:[#allocation4 + $0x78] sm:$0xff]  ;;  %2160 = vmatprep.subr.mxu0 %v70_v0  ;;  %v53_v3 = vld [vmem:[#allocation4 + $0x70] sm:$0xff]  ;;  %v68_v4 = vld [vmem:[#allocation4 + $0xe8] sm:$0xff]  ;;  %vm1983_vm3 = vcmask 261120  }
   0xf   :  { %2161 = vmatpush3.msra.mxu0 %v54_v1  ;;  %v52_v5 = vld [vmem:[#allocation4 + $0x68] sm:$0xff]  ;;  %v67_v6 = vld [vmem:[#allocation4 + $0xe0] sm:$0xff]  ;;  %v66_v8 = vld [vmem:[#allocation4 + $0xd8] sm:$0xff] }
  0x10   :  { %2162 = vmatprep.subr.mxu0 %v69_v2  ;;  %v51_v7 = vld [vmem:[#allocation4 + $0x60] sm:$0xff]  ;;  %v50_v9 = vld [vmem:[#allocation4 + $0x58] sm:$0xff]  ;;  %v65_v10 = vld [vmem:[#allocation4 + $0xd0] sm:$0xff] }
  0x11   :  { %2163 = vmatpush3.msra.mxu0 %v53_v3  ;;  %v49_v11 = vld [vmem:[#allocation4 + $0x50] sm:$0xff]  ;;  %v64_v12 = vld [vmem:[#allocation4 + $0xc8] sm:$0xff]  ;;  %v2879_v13 = vld [vmem:[%s3346_s0 + $0x8] sm:$0xff] }
  0x12   :  { %2164 = vmatprep.subr.mxu0 %v68_v4  ;;  %v48_v14 = vld [vmem:[#allocation4 + $0x48] sm:$0xff]  ;;  %135 = vmatprep.mubr.f32.mxu0 %v2879_v13  ;;  %v175_v15 = vld [vmem:[#allocation4 + $0x1f8] sm:$0xff]  ;;  %v63_v16 = vld [vmem:[#allocation4 + $0xc0] sm:$0xff] }
  0x13   :  { %2165 = vmatpush3.msra.mxu0 %v52_v5  ;;  %2195 = vmatprep.subr.mxu1 %v175_v15  ;;  %v159_v17 = vld [vmem:[#allocation4 + $0x178] sm:$0xff]  ;;  %v174_v18 = vld [vmem:[#allocation4 + $0x1f0] sm:$0xff]  ;;  %v47_v19 = vld [vmem:[#allocation4 + $0x40] sm:$0xff] }
  0x14   :  { %2166 = vmatprep.subr.mxu0 %v67_v6  ;;  %2196 = vmatpush3.msra.mxu1 %v159_v17  ;;  %v158_v20 = vld [vmem:[#allocation4 + $0x170] sm:$0xff]  ;;  %v62_v21 = vld [vmem:[#allocation4 + $0xb8] sm:$0xff]  ;;  %v173_v22 = vld [vmem:[#allocation4 + $0x1e8] sm:$0xff] }
  0x15   :  { %2167 = vmatpush3.msra.mxu0 %v51_v7  ;;  %2197 = vmatprep.subr.mxu1 %v174_v18  ;;  %v157_v23 = vld [vmem:[#allocation4 + $0x168] sm:$0xff]  ;;  %v46_v24 = vld [vmem:[#allocation4 + $0x38] sm:$0xff]  ;;  %v172_v25 = vld [vmem:[#allocation4 + $0x1e0] sm:$0xff] }
  0x16   :  { %2168 = vmatprep.subr.mxu0 %v66_v8  ;;  %2198 = vmatpush3.msra.mxu1 %v158_v20  ;;  %v61_v26 = vld [vmem:[#allocation4 + $0xb0] sm:$0xff]  ;;  %v156_v27 = vld [vmem:[#allocation4 + $0x160] sm:$0xff]  ;;  %v171_v29 = vld [vmem:[#allocation4 + $0x1d8] sm:$0xff] }
  0x17   :  { %2169 = vmatpush3.msra.mxu0 %v50_v9  ;;  %2199 = vmatprep.subr.mxu1 %v173_v22  ;;  %v45_v28 = vld [vmem:[#allocation4 + $0x30] sm:$0xff]  ;;  %v60_v30 = vld [vmem:[#allocation4 + $0xa8] sm:$0xff]  ;;  %v155_v31 = vld [vmem:[#allocation4 + $0x158] sm:$0xff] }
  0x18   :  { %2170 = vmatprep.subr.mxu0 %v65_v10  ;;  %2200 = vmatpush3.msra.mxu1 %v157_v23  ;;  %v44_v32 = vld [vmem:[#allocation4 + $0x28] sm:$0xff]  ;;  %v170_v33 = vld [vmem:[#allocation4 + $0x1d0] sm:$0xff]  ;;  %v59_v34 = vld [vmem:[#allocation4 + $0xa0] sm:$0xff] }
  0x19   :  { %2171 = vmatpush3.msra.mxu0 %v49_v11  ;;  %2201 = vmatprep.subr.mxu1 %v172_v25  ;;  %v154_v35 = vld [vmem:[#allocation4 + $0x150] sm:$0xff]  ;;  %v43_v36 = vld [vmem:[#allocation4 + $0x20] sm:$0xff]  ;;  %v169_v37 = vld [vmem:[#allocation4 + $0x1c8] sm:$0xff] }
  0x1a   :  { %2172 = vmatprep.subr.mxu0 %v64_v12  ;;  %2202 = vmatpush3.msra.mxu1 %v156_v27  ;;  %v58_v38 = vld [vmem:[#allocation4 + $0x98] sm:$0xff]  ;;  %v153_v39 = vld [vmem:[#allocation4 + $0x148] sm:$0xff]  ;;  %v168_v41 = vld [vmem:[#allocation4 + $0x1c0] sm:$0xff] }
  0x1b   :  { %2173 = vmatpush3.msra.mxu0 %v48_v14  ;;  %2203 = vmatprep.subr.mxu1 %v171_v29  ;;  %v42_v40 = vld [vmem:[#allocation4 + $0x18] sm:$0xff]  ;;  %v57_v42 = vld [vmem:[#allocation4 + $0x90] sm:$0xff]  ;;  %v152_v43 = vld [vmem:[#allocation4 + $0x140] sm:$0xff] }
  0x1c   :  { %2174 = vmatprep.subr.mxu0 %v63_v16  ;;  %2204 = vmatpush3.msra.mxu1 %v155_v31  ;;  %v41_v44 = vld [vmem:[#allocation4 + $0x10] sm:$0xff]  ;;  %v167_v45 = vld [vmem:[#allocation4 + $0x1b8] sm:$0xff]  ;;  %v56_v46 = vld [vmem:[#allocation4 + $0x88] sm:$0xff] }
  0x1d   :  { %2175 = vmatpush3.msra.mxu0 %v47_v19  ;;  %2205 = vmatprep.subr.mxu1 %v170_v33  ;;  %v151_v47 = vld [vmem:[#allocation4 + $0x138] sm:$0xff]  ;;  %v40_v48 = vld [vmem:[#allocation4 + $0x8] sm:$0xff]  ;;  %v166_v49 = vld [vmem:[#allocation4 + $0x1b0] sm:$0xff] }
  0x1e   :  { %2176 = vmatprep.subr.mxu0 %v62_v21  ;;  %2206 = vmatpush3.msra.mxu1 %v154_v35  ;;  %v55_v50 = vld [vmem:[#allocation4 + $0x80] sm:$0xff]  ;;  %v150_v51 = vld [vmem:[#allocation4 + $0x130] sm:$0xff]  ;;  %v165_v53 = vld [vmem:[#allocation4 + $0x1a8] sm:$0xff] }
  0x1f   :  { %2177 = vmatpush3.msra.mxu0 %v46_v24  ;;  %2207 = vmatprep.subr.mxu1 %v169_v37  ;;  %v39_v52 = vld [vmem:[#allocation4] sm:$0xff]  ;;  %v2885_v54 = vld [vmem:[%s3346_s0] sm:$0xff]  ;;  %v279_v55 = vld [vmem:[#allocation4 + $0x2f8] sm:$0xff] }
  0x20   :  { %2178 = vmatprep.subr.mxu0 %v61_v26  ;;  %2208 = vmatpush3.msra.mxu1 %v153_v39  ;;  %v263_v56 = vld [vmem:[#allocation4 + $0x278] sm:$0xff]  ;;  %v149_v57 = vld [vmem:[#allocation4 + $0x128] sm:$0xff]  ;;  %v278_v58 = vld [vmem:[#allocation4 + $0x2f0] sm:$0xff] }
  0x21   :  { %2179 = vmatpush3.msra.mxu0 %v45_v28  ;;  %2209 = vmatprep.subr.mxu1 %v168_v41  ;;  %v164_v59 = vld [vmem:[#allocation4 + $0x1a0] sm:$0xff]  ;;  %v262_v60 = vld [vmem:[#allocation4 + $0x270] sm:$0xff]  ;;  %v277_v62 = vld [vmem:[#allocation4 + $0x2e8] sm:$0xff] }
  0x22   :  { %2180 = vmatprep.subr.mxu0 %v60_v30  ;;  %2210 = vmatpush3.msra.mxu1 %v152_v43  ;;  %v148_v61 = vld [vmem:[#allocation4 + $0x120] sm:$0xff]  ;;  %v163_v63 = vld [vmem:[#allocation4 + $0x198] sm:$0xff]  ;;  %v261_v0 = vld [vmem:[#allocation4 + $0x268] sm:$0xff] }
  0x23   :  { %2181 = vmatpush3.msra.mxu0 %v44_v32  ;;  %2211 = vmatprep.subr.mxu1 %v167_v45  ;;  %v147_v1 = vld [vmem:[#allocation4 + $0x118] sm:$0xff]  ;;  %v276_v2 = vld [vmem:[#allocation4 + $0x2e0] sm:$0xff]  ;;  %v162_v3 = vld [vmem:[#allocation4 + $0x190] sm:$0xff] }
  0x24   :  { %2182 = vmatprep.subr.mxu0 %v59_v34  ;;  %2212 = vmatpush3.msra.mxu1 %v151_v47  ;;  %v260_v4 = vld [vmem:[#allocation4 + $0x260] sm:$0xff]  ;;  %v146_v5 = vld [vmem:[#allocation4 + $0x110] sm:$0xff]  ;;  %v275_v6 = vld [vmem:[#allocation4 + $0x2d8] sm:$0xff] }
  0x25   :  { %2183 = vmatpush3.msra.mxu0 %v43_v36  ;;  %2213 = vmatprep.subr.mxu1 %v166_v49  ;;  %v161_v7 = vld [vmem:[#allocation4 + $0x188] sm:$0xff]  ;;  %v259_v8 = vld [vmem:[#allocation4 + $0x258] sm:$0xff]  ;;  %v274_v10 = vld [vmem:[#allocation4 + $0x2d0] sm:$0xff] }
  0x26   :  { %2184 = vmatprep.subr.mxu0 %v58_v38  ;;  %2214 = vmatpush3.msra.mxu1 %v150_v51  ;;  %v145_v9 = vld [vmem:[#allocation4 + $0x108] sm:$0xff]  ;;  %v160_v11 = vld [vmem:[#allocation4 + $0x180] sm:$0xff]  ;;  %v258_v12 = vld [vmem:[#allocation4 + $0x250] sm:$0xff] }
  0x27   :  { %2185 = vmatpush3.msra.mxu0 %v42_v40  ;;  %2215 = vmatprep.subr.mxu1 %v165_v53  ;;  %v144_v14 = vld [vmem:[#allocation4 + $0x100] sm:$0xff]  ;;  %v273_v15 = vld [vmem:[#allocation4 + $0x2c8] sm:$0xff]  ;;  %v383_v18 = vld [vmem:[#allocation4 + $0x3f8] sm:$0xff] }
  0x28   :  { %2186 = vmatprep.subr.mxu0 %v57_v42  ;;  %2216 = vmatpush3.msra.mxu1 %v149_v57  ;;  %v257_v16 = vld [vmem:[#allocation4 + $0x248] sm:$0xff]  ;;  %v272_v17 = vld [vmem:[#allocation4 + $0x2c0] sm:$0xff]  ;;  %v271_v20 = vld [vmem:[#allocation4 + $0x2b8] sm:$0xff] }
  0x29   :  { %2187 = vmatpush3.msra.mxu0 %v41_v44  ;;  %2217 = vmatprep.subr.mxu1 %v164_v59  ;;  %v256_v19 = vld [vmem:[#allocation4 + $0x240] sm:$0xff]  ;;  %v367_v21 = vld [vmem:[#allocation4 + $0x378] sm:$0xff]  ;;  %v382_v23 = vld [vmem:[#allocation4 + $0x3f0] sm:$0xff] }
  0x2a   :  { %2188 = vmatprep.subr.mxu0 %v56_v46  ;;  %2218 = vmatpush3.msra.mxu1 %v148_v61  ;;  %v255_v22 = vld [vmem:[#allocation4 + $0x238] sm:$0xff]  ;;  %v270_v24 = vld [vmem:[#allocation4 + $0x2b0] sm:$0xff]  ;;  %v381_v27 = vld [vmem:[#allocation4 + $0x3e8] sm:$0xff] }
  0x2b   :  { %2189 = vmatpush3.msra.mxu0 %v40_v48  ;;  %2219 = vmatprep.subr.mxu1 %v163_v63  ;;  %v366_v25 = vld [vmem:[#allocation4 + $0x370] sm:$0xff]  ;;  %v269_v28 = vld [vmem:[#allocation4 + $0x2a8] sm:$0xff]  ;;  %v380_v31 = vld [vmem:[#allocation4 + $0x3e0] sm:$0xff] }
  0x2c   :  { %2190 = vmatprep.subr.mxu0 %v55_v50  ;;  %2220 = vmatpush3.msra.mxu1 %v147_v1  ;;  %v254_v26 = vld [vmem:[#allocation4 + $0x230] sm:$0xff]  ;;  %v365_v29 = vld [vmem:[#allocation4 + $0x368] sm:$0xff]  ;;  %v268_v32 = vld [vmem:[#allocation4 + $0x2a0] sm:$0xff] }
  0x2d   :  { %2191 = vmatpush3.msra.mxu0 %v39_v52  ;;  %2221 = vmatprep.subr.mxu1 %v162_v3  ;;  %v253_v30 = vld [vmem:[#allocation4 + $0x228] sm:$0xff]  ;;  %v364_v33 = vld [vmem:[#allocation4 + $0x360] sm:$0xff]  ;;  %v379_v35 = vld [vmem:[#allocation4 + $0x3d8] sm:$0xff] }
  0x2e   :  { %136 = vmatmul.mubr.f32.vlgmr.msra.gmra.mxu0 %v2885_v54  ;;  %2230 = vmatprep.subr.mxu0 %v279_v55  ;;  %v252_v34 = vld [vmem:[#allocation4 + $0x220] sm:$0xff]  ;;  %v267_v36 = vld [vmem:[#allocation4 + $0x298] sm:$0xff]  ;;  %v378_v39 = vld [vmem:[#allocation4 + $0x3d0] sm:$0xff] }
  0x2f   :  { %2231 = vmatpush3.msra.mxu0 %v263_v56  ;;  %2222 = vmatpush3.msra.mxu1 %v146_v5  ;;  %v363_v37 = vld [vmem:[#allocation4 + $0x358] sm:$0xff]  ;;  %v266_v40 = vld [vmem:[#allocation4 + $0x290] sm:$0xff]  ;;  %v377_v43 = vld [vmem:[#allocation4 + $0x3c8] sm:$0xff] }
  0x30   :  { %2232 = vmatprep.subr.mxu0 %v278_v58  ;;  %2223 = vmatprep.subr.mxu1 %v161_v7  ;;  %v251_v38 = vld [vmem:[#allocation4 + $0x218] sm:$0xff]  ;;  %v362_v41 = vld [vmem:[#allocation4 + $0x350] sm:$0xff]  ;;  %v265_v44 = vld [vmem:[#allocation4 + $0x288] sm:$0xff] }
  0x31   :  { %2233 = vmatpush3.msra.mxu0 %v262_v60  ;;  %2224 = vmatpush3.msra.mxu1 %v145_v9  ;;  %v250_v42 = vld [vmem:[#allocation4 + $0x210] sm:$0xff]  ;;  %v361_v45 = vld [vmem:[#allocation4 + $0x348] sm:$0xff]  ;;  %v376_v47 = vld [vmem:[#allocation4 + $0x3c0] sm:$0xff] }
  0x32   :  { %2234 = vmatprep.subr.mxu0 %v277_v62  ;;  %2225 = vmatprep.subr.mxu1 %v160_v11  ;;  %v249_v46 = vld [vmem:[#allocation4 + $0x208] sm:$0xff]  ;;  %v264_v48 = vld [vmem:[#allocation4 + $0x280] sm:$0xff]  ;;  %v375_v51 = vld [vmem:[#allocation4 + $0x3b8] sm:$0xff] }
  0x33   :  { %2235 = vmatpush3.msra.mxu0 %v261_v0  ;;  %2226 = vmatpush3.msra.mxu1 %v144_v14  ;;  %v360_v49 = vld [vmem:[#allocation4 + $0x340] sm:$0xff]  ;;  %v487_v52 = vld [vmem:[#allocation4 + $0x4f8] sm:$0xff]  ;;  %v486_v56 = vld [vmem:[#allocation4 + $0x4f0] sm:$0xff] }
  0x34   :  { %2236 = vmatprep.subr.mxu0 %v276_v2  ;;  %344 = vmatprep.mubr.f32.mxu0 %v2879_v13  ;;  %v248_v50 = vld [vmem:[#allocation4 + $0x200] sm:$0xff]  ;;  %v471_v53 = vld [vmem:[#allocation4 + $0x478] sm:$0xff]  ;;  %v374_v57 = vld [vmem:[#allocation4 + $0x3b0] sm:$0xff] }
  0x35   :  { %2237 = vmatpush3.msra.mxu0 %v260_v4  ;;  %240 = vmatprep.mubr.f32.mxu1 %v2879_v13  ;;  %v359_v55 = vld [vmem:[#allocation4 + $0x338] sm:$0xff]  ;;  %v470_v58 = vld [vmem:[#allocation4 + $0x470] sm:$0xff]  ;;  %v485_v60 = vld [vmem:[#allocation4 + $0x4e8] sm:$0xff] }
  0x36   :  { %2238 = vmatprep.subr.mxu0 %v275_v6  ;;  %2265 = vmatprep.subr.mxu1 %v383_v18  ;;  %v358_v59 = vld [vmem:[#allocation4 + $0x330] sm:$0xff]  ;;  %v373_v61 = vld [vmem:[#allocation4 + $0x3a8] sm:$0xff]  ;;  %v484_v0 = vld [vmem:[#allocation4 + $0x4e0] sm:$0xff] }
  0x37   :  { %2239 = vmatpush3.msra.mxu0 %v259_v8  ;;  %241 = vmatmul.mubr.f32.vlgmr.msra.gmra.mxu1 %v2885_v54  ;;  %v469_v62 = vld [vmem:[#allocation4 + $0x468] sm:$0xff]  ;;  %v372_v1 = vld [vmem:[#allocation4 + $0x3a0] sm:$0xff]  ;;  %v483_v4 = vld [vmem:[#allocation4 + $0x4d8] sm:$0xff] }
  0x38   :  { %2240 = vmatprep.subr.mxu0 %v274_v10  ;;  %2266 = vmatpush3.msra.mxu1 %v367_v21  ;;  %v357_v63 = vld [vmem:[#allocation4 + $0x328] sm:$0xff]  ;;  %v468_v2 = vld [vmem:[#allocation4 + $0x460] sm:$0xff]  ;;  %v371_v5 = vld [vmem:[#allocation4 + $0x398] sm:$0xff] }
  0x39   :  { %2241 = vmatpush3.msra.mxu0 %v258_v12  ;;  %2267 = vmatprep.subr.mxu1 %v382_v23  ;;  %v356_v3 = vld [vmem:[#allocation4 + $0x320] sm:$0xff]  ;;  %v467_v6 = vld [vmem:[#allocation4 + $0x458] sm:$0xff]  ;;  %v482_v8 = vld [vmem:[#allocation4 + $0x4d0] sm:$0xff] }
  0x3a   :  { %2242 = vmatprep.subr.mxu0 %v273_v15  ;;  %2268 = vmatpush3.msra.mxu1 %v366_v25  ;;  %v355_v7 = vld [vmem:[#allocation4 + $0x318] sm:$0xff]  ;;  %v370_v9 = vld [vmem:[#allocation4 + $0x390] sm:$0xff]  ;;  %v481_v12 = vld [vmem:[#allocation4 + $0x4c8] sm:$0xff] }
  0x3b   :  { %2243 = vmatpush3.msra.mxu0 %v257_v16  ;;  %2269 = vmatprep.subr.mxu1 %v381_v27  ;;  %v466_v10 = vld [vmem:[#allocation4 + $0x450] sm:$0xff]  ;;  %v369_v14 = vld [vmem:[#allocation4 + $0x388] sm:$0xff]  ;;  %v368_v18 = vld [vmem:[#allocation4 + $0x380] sm:$0xff] }
  0x3c   :  { %2244 = vmatprep.subr.mxu0 %v272_v17  ;;  %2270 = vmatpush3.msra.mxu1 %v365_v29  ;;  %v354_v11 = vld [vmem:[#allocation4 + $0x310] sm:$0xff]  ;;  %v465_v15 = vld [vmem:[#allocation4 + $0x448] sm:$0xff]  ;;  %v480_v17 = vld [vmem:[#allocation4 + $0x4c0] sm:$0xff] }
  0x3d   :  { %2245 = vmatpush3.msra.mxu0 %v256_v19  ;;  %2271 = vmatprep.subr.mxu1 %v380_v31  ;;  %v353_v16 = vld [vmem:[#allocation4 + $0x308] sm:$0xff]  ;;  %v464_v19 = vld [vmem:[#allocation4 + $0x440] sm:$0xff]  ;;  %v479_v21 = vld [vmem:[#allocation4 + $0x4b8] sm:$0xff] }
  0x3e   :  { %2246 = vmatprep.subr.mxu0 %v271_v20  ;;  %2272 = vmatpush3.msra.mxu1 %v364_v33  ;;  %v352_v20 = vld [vmem:[#allocation4 + $0x300] sm:$0xff]  ;;  %v478_v23 = vld [vmem:[#allocation4 + $0x4b0] sm:$0xff]  ;;  %v575_v27 = vld [vmem:[#allocation4 + $0x578] sm:$0xff] }
  0x3f   :  { %2247 = vmatpush3.msra.mxu0 %v255_v22  ;;  %2273 = vmatprep.subr.mxu1 %v379_v35  ;;  %v463_v22 = vld [vmem:[#allocation4 + $0x438] sm:$0xff]  ;;  %v462_v25 = vld [vmem:[#allocation4 + $0x430] sm:$0xff]  ;;  %v589_v33 = vld [vmem:[#allocation4 + $0x5e8] sm:$0xff] }
  0x40   :  { %2248 = vmatprep.subr.mxu0 %v270_v24  ;;  %2274 = vmatpush3.msra.mxu1 %v363_v37  ;;  %v591_v24 = vld [vmem:[#allocation4 + $0x5f8] sm:$0xff]  ;;  %v590_v29 = vld [vmem:[#allocation4 + $0x5f0] sm:$0xff]  ;;  %v573_v35 = vld [vmem:[#allocation4 + $0x568] sm:$0xff] }
  0x41   :  { %2249 = vmatpush3.msra.mxu0 %v254_v26  ;;  %2275 = vmatprep.subr.mxu1 %v378_v39  ;;  %v477_v26 = vld [vmem:[#allocation4 + $0x4a8] sm:$0xff]  ;;  %v574_v31 = vld [vmem:[#allocation4 + $0x570] sm:$0xff]  ;;  %v588_v37 = vld [vmem:[#allocation4 + $0x5e0] sm:$0xff] }
  0x42   :  { %2250 = vmatprep.subr.mxu0 %v269_v28  ;;  %2276 = vmatpush3.msra.mxu1 %v362_v41  ;;  %v461_v28 = vld [vmem:[#allocation4 + $0x428] sm:$0xff]  ;;  %v572_v39 = vld [vmem:[#allocation4 + $0x560] sm:$0xff]  ;;  %v587_v41 = vld [vmem:[#allocation4 + $0x5d8] sm:$0xff] }
  0x43   :  { %2251 = vmatpush3.msra.mxu0 %v253_v30  ;;  %2277 = vmatprep.subr.mxu1 %v377_v43  ;;  %v476_v30 = vld [vmem:[#allocation4 + $0x4a0] sm:$0xff]  ;;  %v571_v43 = vld [vmem:[#allocation4 + $0x558] sm:$0xff] }
  0x44   :  { %2252 = vmatprep.subr.mxu0 %v268_v32  ;;  %2278 = vmatpush3.msra.mxu1 %v361_v45  ;;  %v460_v32 = vld [vmem:[#allocation4 + $0x420] sm:$0xff]  ;;  %v586_v45 = vld [vmem:[#allocation4 + $0x5d0] sm:$0xff] }
  0x45   :  { %2253 = vmatpush3.msra.mxu0 %v252_v34  ;;  %2279 = vmatprep.subr.mxu1 %v376_v47  ;;  %v475_v34 = vld [vmem:[#allocation4 + $0x498] sm:$0xff]  ;;  %v570_v47 = vld [vmem:[#allocation4 + $0x550] sm:$0xff] }
  0x46   :  { %2254 = vmatprep.subr.mxu0 %v267_v36  ;;  %2280 = vmatpush3.msra.mxu1 %v360_v49  ;;  %v459_v36 = vld [vmem:[#allocation4 + $0x418] sm:$0xff]  ;;  %v585_v49 = vld [vmem:[#allocation4 + $0x5c8] sm:$0xff] }
  0x47   :  { %2255 = vmatpush3.msra.mxu0 %v251_v38  ;;  %2281 = vmatprep.subr.mxu1 %v375_v51  ;;  %v474_v38 = vld [vmem:[#allocation4 + $0x490] sm:$0xff]  ;;  %v679_v51 = vld [vmem:[#allocation4 + $0x678] sm:$0xff] }
  0x48   :  { %2256 = vmatprep.subr.mxu0 %v266_v40  ;;  %2282 = vmatpush3.msra.mxu1 %v359_v55  ;;  %v458_v40 = vld [vmem:[#allocation4 + $0x410] sm:$0xff]  ;;  %v584_v55 = vld [vmem:[#allocation4 + $0x5c0] sm:$0xff] }
  0x49   :  { %2257 = vmatpush3.msra.mxu0 %v250_v42  ;;  %2283 = vmatprep.subr.mxu1 %v374_v57  ;;  %v473_v42 = vld [vmem:[#allocation4 + $0x488] sm:$0xff]  ;;  %v568_v57 = vld [vmem:[#allocation4 + $0x540] sm:$0xff] }
  0x4a   :  { %2258 = vmatprep.subr.mxu0 %v265_v44  ;;  %2284 = vmatpush3.msra.mxu1 %v358_v59  ;;  %v457_v44 = vld [vmem:[#allocation4 + $0x408] sm:$0xff]  ;;  %v583_v59 = vld [vmem:[#allocation4 + $0x5b8] sm:$0xff] }
  0x4b   :  { %2259 = vmatpush3.msra.mxu0 %v249_v46  ;;  %2285 = vmatprep.subr.mxu1 %v373_v61  ;;  %v472_v46 = vld [vmem:[#allocation4 + $0x480] sm:$0xff]  ;;  %v567_v61 = vld [vmem:[#allocation4 + $0x538] sm:$0xff] }
  0x4c   :  { %2260 = vmatprep.subr.mxu0 %v264_v48  ;;  %2286 = vmatpush3.msra.mxu1 %v357_v63  ;;  %v456_v48 = vld [vmem:[#allocation4 + $0x400] sm:$0xff]  ;;  %v582_v63 = vld [vmem:[#allocation4 + $0x5b0] sm:$0xff] }
  0x4d   :  { %2261 = vmatpush3.msra.mxu0 %v248_v50  ;;  %2287 = vmatprep.subr.mxu1 %v372_v1  ;;  %v695_v50 = vld [vmem:[#allocation4 + $0x6f8] sm:$0xff]  ;;  %v566_v1 = vld [vmem:[#allocation4 + $0x530] sm:$0xff] }
  0x4e   :  { %345 = vmatmul.mubr.f32.vlgmr.msra.gmra.mxu0 %v2885_v54  ;;  %2300 = vmatprep.subr.mxu0 %v487_v52  ;;  %v569_v52 = vld [vmem:[#allocation4 + $0x548] sm:$0xff] }
  0x4f   :  { %2301 = vmatpush3.msra.mxu0 %v471_v53  ;;  %2288 = vmatpush3.msra.mxu1 %v356_v3  ;;  %v694_v53 = vld [vmem:[#allocation4 + $0x6f0] sm:$0xff]  ;;  %v581_v3 = vld [vmem:[#allocation4 + $0x5a8] sm:$0xff] }
  0x50   :  { %2302 = vmatprep.subr.mxu0 %v486_v56  ;;  %2289 = vmatprep.subr.mxu1 %v371_v5  ;;  %v678_v56 = vld [vmem:[#allocation4 + $0x670] sm:$0xff]  ;;  %v565_v5 = vld [vmem:[#allocation4 + $0x528] sm:$0xff] }
  0x51   :  { %2303 = vmatpush3.msra.mxu0 %v470_v58  ;;  %2290 = vmatpush3.msra.mxu1 %v355_v7  ;;  %v693_v58 = vld [vmem:[#allocation4 + $0x6e8] sm:$0xff]  ;;  %v580_v7 = vld [vmem:[#allocation4 + $0x5a0] sm:$0xff] }
  0x52   :  { %2304 = vmatprep.subr.mxu0 %v485_v60  ;;  %2291 = vmatprep.subr.mxu1 %v370_v9  ;;  %v677_v60 = vld [vmem:[#allocation4 + $0x668] sm:$0xff]  ;;  %v564_v9 = vld [vmem:[#allocation4 + $0x520] sm:$0xff] }
  0x53   :  { %2305 = vmatpush3.msra.mxu0 %v469_v62  ;;  %2292 = vmatpush3.msra.mxu1 %v354_v11  ;;  %v692_v62 = vld [vmem:[#allocation4 + $0x6e0] sm:$0xff]  ;;  %v579_v11 = vld [vmem:[#allocation4 + $0x598] sm:$0xff] }
  0x54   :  { %2306 = vmatprep.subr.mxu0 %v484_v0  ;;  %2293 = vmatprep.subr.mxu1 %v369_v14  ;;  %v676_v0 = vld [vmem:[#allocation4 + $0x660] sm:$0xff]  ;;  %v563_v14 = vld [vmem:[#allocation4 + $0x518] sm:$0xff] }
  0x55   :  { %2307 = vmatpush3.msra.mxu0 %v468_v2  ;;  %2294 = vmatpush3.msra.mxu1 %v353_v16  ;;  %v691_v2 = vld [vmem:[#allocation4 + $0x6d8] sm:$0xff]  ;;  %v578_v16 = vld [vmem:[#allocation4 + $0x590] sm:$0xff] }
  0x56   :  { %2308 = vmatprep.subr.mxu0 %v483_v4  ;;  %2295 = vmatprep.subr.mxu1 %v368_v18  ;;  %v675_v4 = vld [vmem:[#allocation4 + $0x658] sm:$0xff]  ;;  %v562_v18 = vld [vmem:[#allocation4 + $0x510] sm:$0xff] }
  0x57   :  { %2309 = vmatpush3.msra.mxu0 %v467_v6  ;;  %2296 = vmatpush3.msra.mxu1 %v352_v20  ;;  %v690_v6 = vld [vmem:[#allocation4 + $0x6d0] sm:$0xff]  ;;  %v577_v20 = vld [vmem:[#allocation4 + $0x588] sm:$0xff] }
  0x58   :  { %2310 = vmatprep.subr.mxu0 %v482_v8  ;;  %552 = vmatprep.mubr.f32.mxu0 %v2879_v13  ;;  %v674_v8 = vld [vmem:[#allocation4 + $0x650] sm:$0xff] }
  0x59   :  { %2311 = vmatpush3.msra.mxu0 %v466_v10  ;;  %448 = vmatprep.mubr.f32.mxu1 %v2879_v13  ;;  %v689_v10 = vld [vmem:[#allocation4 + $0x6c8] sm:$0xff] }
  0x5a   :  { %2312 = vmatprep.subr.mxu0 %v481_v12  ;;  %2335 = vmatprep.subr.mxu1 %v591_v24  ;;  %v673_v12 = vld [vmem:[#allocation4 + $0x648] sm:$0xff]  ;;  %v576_v24 = vld [vmem:[#allocation4 + $0x580] sm:$0xff] }
  0x5b   :  { %2313 = vmatpush3.msra.mxu0 %v465_v15  ;;  %449 = vmatmul.mubr.f32.vlgmr.msra.gmra.mxu1 %v2885_v54  ;;  %v688_v15 = vld [vmem:[#allocation4 + $0x6c0] sm:$0xff] }
  0x5c   :  { %2314 = vmatprep.subr.mxu0 %v480_v17  ;;  %2336 = vmatpush3.msra.mxu1 %v575_v27  ;;  %v672_v17 = vld [vmem:[#allocation4 + $0x640] sm:$0xff]  ;;  %v685_v27 = vld [vmem:[#allocation4 + $0x6a8] sm:$0xff] }
  0x5d   :  { %2315 = vmatpush3.msra.mxu0 %v464_v19  ;;  %2337 = vmatprep.subr.mxu1 %v590_v29  ;;  %v687_v19 = vld [vmem:[#allocation4 + $0x6b8] sm:$0xff]  ;;  %v684_v29 = vld [vmem:[#allocation4 + $0x6a0] sm:$0xff] }
  0x5e   :  { %2316 = vmatprep.subr.mxu0 %v479_v21  ;;  %2338 = vmatpush3.msra.mxu1 %v574_v31  ;;  %v671_v21 = vld [vmem:[#allocation4 + $0x638] sm:$0xff]  ;;  %v668_v31 = vld [vmem:[#allocation4 + $0x620] sm:$0xff] }
  0x5f   :  { %2317 = vmatpush3.msra.mxu0 %v463_v22  ;;  %2339 = vmatprep.subr.mxu1 %v589_v33  ;;  %v561_v22 = vld [vmem:[#allocation4 + $0x508] sm:$0xff]  ;;  %v783_v33 = vld [vmem:[#allocation4 + $0x778] sm:$0xff] }
  0x60   :  { %2318 = vmatprep.subr.mxu0 %v478_v23  ;;  %2340 = vmatpush3.msra.mxu1 %v573_v35  ;;  %v686_v23 = vld [vmem:[#allocation4 + $0x6b0] sm:$0xff] }
  0x61   :  { %2319 = vmatpush3.msra.mxu0 %v462_v25  ;;  %2341 = vmatprep.subr.mxu1 %v588_v37  ;;  %v670_v25 = vld [vmem:[#allocation4 + $0x630] sm:$0xff] }
  0x62   :  { %2320 = vmatprep.subr.mxu0 %v477_v26  ;;  %2342 = vmatpush3.msra.mxu1 %v572_v39  ;;  %v560_v26 = vld [vmem:[#allocation4 + $0x500] sm:$0xff]  ;;  %v798_v35 = vld [vmem:[#allocation4 + $0x7f0] sm:$0xff]  ;;  %v797_v39 = vld [vmem:[#allocation4 + $0x7e8] sm:$0xff] }
  0x63   :  { %2321 = vmatpush3.msra.mxu0 %v461_v28  ;;  %2343 = vmatprep.subr.mxu1 %v587_v41  ;;  %v669_v28 = vld [vmem:[#allocation4 + $0x628] sm:$0xff]  ;;  %v782_v37 = vld [vmem:[#allocation4 + $0x770] sm:$0xff] }
  0x64   :  { %2322 = vmatprep.subr.mxu0 %v476_v30  ;;  %2344 = vmatpush3.msra.mxu1 %v571_v43  ;;  %v799_v30 = vld [vmem:[#allocation4 + $0x7f8] sm:$0xff]  ;;  %v781_v41 = vld [vmem:[#allocation4 + $0x768] sm:$0xff]  ;;  %v680_v43 = vld [vmem:[#allocation4 + $0x680] sm:$0xff] }
  0x65   :  { %2323 = vmatpush3.msra.mxu0 %v460_v32  ;;  %2345 = vmatprep.subr.mxu1 %v586_v45  ;;  %v683_v32 = vld [vmem:[#allocation4 + $0x698] sm:$0xff]  ;;  %v664_v45 = vld [vmem:[#allocation4 + $0x600] sm:$0xff] }
  0x66   :  { %2324 = vmatprep.subr.mxu0 %v475_v34  ;;  %2346 = vmatpush3.msra.mxu1 %v570_v47  ;;  %v667_v34 = vld [vmem:[#allocation4 + $0x618] sm:$0xff] }
  0x67   :  { %2325 = vmatpush3.msra.mxu0 %v459_v36  ;;  %2347 = vmatprep.subr.mxu1 %v585_v49  ;;  %v682_v36 = vld [vmem:[#allocation4 + $0x690] sm:$0xff]  ;;  %v903_v47 = vld [vmem:[#allocation4 + $0x8f8] sm:$0xff] }
  0x68   :  { %2326 = vmatprep.subr.mxu0 %v474_v38  ;;  %2348 = vmatpush3.msra.mxu1 %v569_v52  ;;  %v666_v38 = vld [vmem:[#allocation4 + $0x610] sm:$0xff]  ;;  %v779_v49 = vld [vmem:[#allocation4 + $0x758] sm:$0xff] }
  0x69   :  { %2327 = vmatpush3.msra.mxu0 %v458_v40  ;;  %2349 = vmatprep.subr.mxu1 %v584_v55  ;;  %v681_v40 = vld [vmem:[#allocation4 + $0x688] sm:$0xff]  ;;  %v886_v52 = vld [vmem:[#allocation4 + $0x870] sm:$0xff] }
  0x6a   :  { %2328 = vmatprep.subr.mxu0 %v473_v42  ;;  %2350 = vmatpush3.msra.mxu1 %v568_v57  ;;  %v796_v42 = vld [vmem:[#allocation4 + $0x7e0] sm:$0xff]  ;;  %v901_v55 = vld [vmem:[#allocation4 + $0x8e8] sm:$0xff] }
  0x6b   :  { %2329 = vmatpush3.msra.mxu0 %v457_v44  ;;  %2351 = vmatprep.subr.mxu1 %v583_v59  ;;  %v780_v44 = vld [vmem:[#allocation4 + $0x760] sm:$0xff]  ;;  %v885_v57 = vld [vmem:[#allocation4 + $0x868] sm:$0xff] }
  0x6c   :  { %2330 = vmatprep.subr.mxu0 %v472_v46  ;;  %2352 = vmatpush3.msra.mxu1 %v567_v61  ;;  %v795_v46 = vld [vmem:[#allocation4 + $0x7d8] sm:$0xff]  ;;  %v900_v59 = vld [vmem:[#allocation4 + $0x8e0] sm:$0xff] }
  0x6d   :  { %2331 = vmatpush3.msra.mxu0 %v456_v48  ;;  %2353 = vmatprep.subr.mxu1 %v582_v63  ;;  %v887_v48 = vld [vmem:[#allocation4 + $0x878] sm:$0xff]  ;;  %v884_v61 = vld [vmem:[#allocation4 + $0x860] sm:$0xff] }
  0x6e   :  { %553 = vmatmul.mubr.f32.vlgmr.msra.gmra.mxu0 %v2885_v54  ;;  %2370 = vmatprep.subr.mxu0 %v695_v50  ;;  %v902_v50 = vld [vmem:[#allocation4 + $0x8f0] sm:$0xff]  ;;  %v899_v63 = vld [vmem:[#allocation4 + $0x8d8] sm:$0xff] }
  0x6f   :  { %2371 = vmatpush3.msra.mxu0 %v679_v51  ;;  %2354 = vmatpush3.msra.mxu1 %v566_v1  ;;  %v794_v51 = vld [vmem:[#allocation4 + $0x7d0] sm:$0xff]  ;;  %v883_v1 = vld [vmem:[#allocation4 + $0x858] sm:$0xff] }
  0x70   :  { %2372 = vmatprep.subr.mxu0 %v694_v53  ;;  %2355 = vmatprep.subr.mxu1 %v581_v3  ;;  %v778_v53 = vld [vmem:[#allocation4 + $0x750] sm:$0xff] }
  0x71   :  { %2373 = vmatpush3.msra.mxu0 %v678_v56  ;;  %2356 = vmatpush3.msra.mxu1 %v565_v5  ;;  %v793_v56 = vld [vmem:[#allocation4 + $0x7c8] sm:$0xff]  ;;  %v898_v3 = vld [vmem:[#allocation4 + $0x8d0] sm:$0xff] }
  0x72   :  { %2374 = vmatprep.subr.mxu0 %v693_v58  ;;  %2357 = vmatprep.subr.mxu1 %v580_v7  ;;  %v777_v58 = vld [vmem:[#allocation4 + $0x748] sm:$0xff]  ;;  %v882_v5 = vld [vmem:[#allocation4 + $0x850] sm:$0xff] }
  0x73   :  { %2375 = vmatpush3.msra.mxu0 %v677_v60  ;;  %2358 = vmatpush3.msra.mxu1 %v564_v9  ;;  %v792_v60 = vld [vmem:[#allocation4 + $0x7c0] sm:$0xff]  ;;  %v897_v7 = vld [vmem:[#allocation4 + $0x8c8] sm:$0xff] }
  0x74   :  { %2376 = vmatprep.subr.mxu0 %v692_v62  ;;  %2359 = vmatprep.subr.mxu1 %v579_v11  ;;  %v776_v62 = vld [vmem:[#allocation4 + $0x740] sm:$0xff]  ;;  %v881_v9 = vld [vmem:[#allocation4 + $0x848] sm:$0xff] }
  0x75   :  { %2377 = vmatpush3.msra.mxu0 %v676_v0  ;;  %2360 = vmatpush3.msra.mxu1 %v563_v14  ;;  %v791_v0 = vld [vmem:[#allocation4 + $0x7b8] sm:$0xff]  ;;  %v896_v11 = vld [vmem:[#allocation4 + $0x8c0] sm:$0xff] }
  0x76   :  { %2378 = vmatprep.subr.mxu0 %v691_v2  ;;  %2361 = vmatprep.subr.mxu1 %v578_v16  ;;  %v775_v2 = vld [vmem:[#allocation4 + $0x738] sm:$0xff]  ;;  %v880_v14 = vld [vmem:[#allocation4 + $0x840] sm:$0xff] }
  0x77   :  { %2379 = vmatpush3.msra.mxu0 %v675_v4  ;;  %2362 = vmatpush3.msra.mxu1 %v562_v18  ;;  %v790_v4 = vld [vmem:[#allocation4 + $0x7b0] sm:$0xff]  ;;  %v895_v16 = vld [vmem:[#allocation4 + $0x8b8] sm:$0xff] }
  0x78   :  { %2380 = vmatprep.subr.mxu0 %v690_v6  ;;  %2363 = vmatprep.subr.mxu1 %v577_v20  ;;  %v774_v6 = vld [vmem:[#allocation4 + $0x730] sm:$0xff]  ;;  %v879_v18 = vld [vmem:[#allocation4 + $0x838] sm:$0xff] }
  0x79   :  { %2381 = vmatpush3.msra.mxu0 %v674_v8  ;;  %2364 = vmatpush3.msra.mxu1 %v561_v22  ;;  %v789_v8 = vld [vmem:[#allocation4 + $0x7a8] sm:$0xff]  ;;  %v894_v20 = vld [vmem:[#allocation4 + $0x8b0] sm:$0xff] }
  0x7a   :  { %2382 = vmatprep.subr.mxu0 %v689_v10  ;;  %2365 = vmatprep.subr.mxu1 %v576_v24  ;;  %v773_v10 = vld [vmem:[#allocation4 + $0x728] sm:$0xff]  ;;  %v878_v22 = vld [vmem:[#allocation4 + $0x830] sm:$0xff] }
  0x7b   :  { %2383 = vmatpush3.msra.mxu0 %v673_v12  ;;  %2366 = vmatpush3.msra.mxu1 %v560_v26  ;;  %v788_v12 = vld [vmem:[#allocation4 + $0x7a0] sm:$0xff]  ;;  %v893_v24 = vld [vmem:[#allocation4 + $0x8a8] sm:$0xff] }
  0x7c   :  { %2384 = vmatprep.subr.mxu0 %v688_v15  ;;  %760 = vmatprep.mubr.f32.mxu0 %v2879_v13  ;;  %v772_v15 = vld [vmem:[#allocation4 + $0x720] sm:$0xff]  ;;  %v877_v26 = vld [vmem:[#allocation4 + $0x828] sm:$0xff] }
  0x7d   :  { %2385 = vmatpush3.msra.mxu0 %v672_v17  ;;  %656 = vmatprep.mubr.f32.mxu1 %v2879_v13  ;;  %v665_v13 = vld [vmem:[#allocation4 + $0x608] sm:$0xff]  ;;  %v787_v17 = vld [vmem:[#allocation4 + $0x798] sm:$0xff] }
  0x7e   :  { %2386 = vmatprep.subr.mxu0 %v687_v19  ;;  %2405 = vmatprep.subr.mxu1 %v799_v30  ;;  %v771_v19 = vld [vmem:[#allocation4 + $0x718] sm:$0xff]  ;;  %v876_v30 = vld [vmem:[#allocation4 + $0x820] sm:$0xff] }
  0x7f   :  { %2387 = vmatpush3.msra.mxu0 %v671_v21  ;;  %657 = vmatmul.mubr.f32.vlgmr.msra.gmra.mxu1 %v2885_v54  ;;  %v786_v21 = vld [vmem:[#allocation4 + $0x790] sm:$0xff] }
  0x80   :  { %2388 = vmatprep.subr.mxu0 %v686_v23  ;;  %2406 = vmatpush3.msra.mxu1 %v783_v33  ;;  %v770_v23 = vld [vmem:[#allocation4 + $0x710] sm:$0xff]  ;;  %v875_v33 = vld [vmem:[#allocation4 + $0x818] sm:$0xff] }
  0x81   :  { %2389 = vmatpush3.msra.mxu0 %v670_v25  ;;  %2407 = vmatprep.subr.mxu1 %v798_v35  ;;  %v785_v25 = vld [vmem:[#allocation4 + $0x788] sm:$0xff]  ;;  %v874_v35 = vld [vmem:[#allocation4 + $0x810] sm:$0xff] }
  0x82   :  { %2390 = vmatprep.subr.mxu0 %v685_v27  ;;  %2408 = vmatpush3.msra.mxu1 %v782_v37  ;;  %v769_v27 = vld [vmem:[#allocation4 + $0x708] sm:$0xff] }
  0x83   :  { %2391 = vmatpush3.msra.mxu0 %v669_v28  ;;  %2409 = vmatprep.subr.mxu1 %v797_v39  ;;  %v892_v28 = vld [vmem:[#allocation4 + $0x8a0] sm:$0xff]  ;;  %v889_v37 = vld [vmem:[#allocation4 + $0x888] sm:$0xff] }
  0x84   :  { %2392 = vmatprep.subr.mxu0 %v684_v29  ;;  %2410 = vmatpush3.msra.mxu1 %v781_v41  ;;  %v784_v29 = vld [vmem:[#allocation4 + $0x780] sm:$0xff]  ;;  %v975_v41 = vlaneseq }
  0x85   :  { %2393 = vmatpush3.msra.mxu0 %v668_v31  ;;  %2411 = vmatprep.subr.mxu1 %v796_v42  ;;  %v768_v31 = vld [vmem:[#allocation4 + $0x700] sm:$0xff] }
  0x86   :  { %2394 = vmatprep.subr.mxu0 %v683_v32  ;;  %2412 = vmatpush3.msra.mxu1 %v780_v44  ;;  %v891_v32 = vld [vmem:[#allocation4 + $0x898] sm:$0xff]  ;;  %v888_v39 = vld [vmem:[#allocation4 + $0x880] sm:$0xff]  ;;  %v2837_v44 = vmov 0.0  }
  0x87   :  { %2395 = vmatpush3.msra.mxu0 %v667_v34  ;;  %2413 = vmatprep.subr.mxu1 %v795_v46  ;;  %v890_v34 = vld [vmem:[#allocation4 + $0x890] sm:$0xff] }
  0x88   :  { %2396 = vmatprep.subr.mxu0 %v682_v36  ;;  %2414 = vmatpush3.msra.mxu1 %v779_v49  ;;  %v2903_v36 = vld [vmem:[%s3346_s0 + $0x8] sm:$0xff] }
  0x89   :  { %2397 = vmatpush3.msra.mxu0 %v666_v38  ;;  %2415 = vmatprep.subr.mxu1 %v794_v51  ;;  %v873_v38 = vld [vmem:[#allocation4 + $0x808] sm:$0xff] }
  0x8a   :  { %2398 = vmatprep.subr.mxu0 %v681_v40  ;;  %2416 = vmatpush3.msra.mxu1 %v778_v53  ;;  %v872_v40 = vld [vmem:[#allocation4 + $0x800] sm:$0xff]  ;;  %v2085_v51 = vld [vmem:[%s3349_s3 + $0x78] sm:$0xff] }
  0x8b   :  { %2399 = vmatpush3.msra.mxu0 %v665_v13  ;;  %2417 = vmatprep.subr.mxu1 %v793_v56  ;;  %v976_v13 = vshrl.u32 %v975_v41, 7  ;;  %v2084_v53 = vld [vmem:[%s3349_s3 + $0x70] sm:$0xff] }
  0x8c   :  { %2400 = vmatprep.subr.mxu0 %v680_v43  ;;  %2418 = vmatpush3.msra.mxu1 %v777_v58  ;;  %v2082_v58 = vld [vmem:[%s3349_s3 + $0x60] sm:$0xff] }
  0x8d   :  { %2401 = vmatpush3.msra.mxu0 %v664_v45  ;;  %2419 = vmatprep.subr.mxu1 %v792_v60  ;;  %vm977_vm0 = vcmp.eq.s32.totalorder %v976_v13, 0  ;;  %v2080_v60 = vld [vmem:[%s3349_s3 + $0x50] sm:$0xff] }
  0x8e   :  { %761 = vmatmul.mubr.f32.vlgmr.msra.gmra.mxu0 %v2885_v54  ;;  %2440 = vmatprep.subr.mxu0 %v903_v47  ;;  %v978_v45 = vsel %vm977_vm0, 1.0, %v2837_v44 }
  0x8f   :  { %2441 = vmatpush3.msra.mxu0 %v887_v48  ;;  %2420 = vmatpush3.msra.mxu1 %v776_v62  ;;  %979 = vst.msk [vmem:[#allocation2 + $0x48] sm:$0xff] %vm141_vm1, %v978_v45  ;;  %1958 = vst.msk [vmem:[#allocation3 + $0x98] sm:$0xff] %vm141_vm1, %v978_v45  ;;  %v2093_v45 = vld [vmem:[%s3349_s3 + $0xa8] sm:$0xff] }
  0x90   :  { %2442 = vmatprep.subr.mxu0 %v902_v50  ;;  %2421 = vmatprep.subr.mxu1 %v791_v0  ;;  %v980_v50 = vld [vmem:[%s3350_s4] sm:$0xff] }
  0x91   :  { %2443 = vmatpush3.msra.mxu0 %v886_v52  ;;  %2422 = vmatpush3.msra.mxu1 %v775_v2 }
  0x92   :  { %2444 = vmatprep.subr.mxu0 %v901_v55  ;;  %2423 = vmatprep.subr.mxu1 %v790_v4 }
  0x93   :  { %2445 = vmatpush3.msra.mxu0 %v885_v57  ;;  %2424 = vmatpush3.msra.mxu1 %v774_v6  ;;  %v2083_v57 = vld [vmem:[%s3349_s3 + $0x68] sm:$0xff] }
  0x94   :  { %2446 = vmatprep.subr.mxu0 %v900_v59  ;;  %2425 = vmatprep.subr.mxu1 %v789_v8  ;;  %v2081_v59 = vld [vmem:[%s3349_s3 + $0x58] sm:$0xff] }
  0x95   :  { %2447 = vmatpush3.msra.mxu0 %v884_v61  ;;  %2426 = vmatpush3.msra.mxu1 %v773_v10 }
  0x96   :  { %2448 = vmatprep.subr.mxu0 %v899_v63  ;;  %2427 = vmatprep.subr.mxu1 %v788_v12  ;;  %v991_v47 = vld [vmem:[#allocation2 + $0x48] sm:$0xff] }
  0x97   :  { %2449 = vmatpush3.msra.mxu0 %v883_v1  ;;  %2428 = vmatpush3.msra.mxu1 %v772_v15 }
  0x98   :  { %2450 = vmatprep.subr.mxu0 %v898_v3  ;;  %2429 = vmatprep.subr.mxu1 %v787_v17 }
  0x99   :  { %2451 = vmatpush3.msra.mxu0 %v882_v5  ;;  %2430 = vmatpush3.msra.mxu1 %v771_v19 }
  0x9a   :  { %2452 = vmatprep.subr.mxu0 %v897_v7  ;;  %2431 = vmatprep.subr.mxu1 %v786_v21 }
  0x9b   :  { %2453 = vmatpush3.msra.mxu0 %v881_v9  ;;  %2432 = vmatpush3.msra.mxu1 %v770_v23 }
  0x9c   :  { %2454 = vmatprep.subr.mxu0 %v896_v11  ;;  %2433 = vmatprep.subr.mxu1 %v785_v25  ;;  %v981_v25 = vld [vmem:[%s3350_s4 + $0x8] sm:$0xff] }
  0x9d   :  { %2455 = vmatpush3.msra.mxu0 %v880_v14  ;;  %2434 = vmatpush3.msra.mxu1 %v769_v27  ;;  %v1082_v27 = vld [vmem:[%s3349_s3 + $0x30] sm:$0xff] }
  0x9e   :  { %2456 = vmatprep.subr.mxu0 %v895_v16  ;;  %2435 = vmatprep.subr.mxu1 %v784_v29  ;;  %v1080_v29 = vld [vmem:[%s3349_s3 + $0x20] sm:$0xff] }
  0x9f   :  { %2457 = vmatpush3.msra.mxu0 %v879_v18  ;;  %2436 = vmatpush3.msra.mxu1 %v768_v31  ;;  %v1078_v31 = vld [vmem:[%s3349_s3 + $0x10] sm:$0xff] }
  0xa0   :  { %2458 = vmatprep.subr.mxu0 %v894_v20  ;;  %864 = vmatprep.mubr.f32.mxu1 %v2903_v36 }
  0xa1   :  { %2459 = vmatpush3.msra.mxu0 %v878_v22  ;;  %968 = vmatprep.mubr.f32.mxu0 %v2903_v36 }
  0xa2   :  { %2460 = vmatprep.subr.mxu0 %v893_v24  ;;  %865 = vmatmul.mubr.f32.vlgmr.msra.gmra.mxu1 %v2885_v54 }
  0xa3   :  { %2461 = vmatpush3.msra.mxu0 %v877_v26  ;;  %2612 = vmatprep.subr.mxu1 %v991_v47  ;;  %v1083_v26 = vld [vmem:[%s3349_s3 + $0x38] sm:$0xff] }
  0xa4   :  { %2462 = vmatprep.subr.mxu0 %v892_v28  ;;  %2613 = vmatpush3.msra.mxu1 %v991_v47  ;;  %v1081_v28 = vld [vmem:[%s3349_s3 + $0x28] sm:$0xff]  ;;  %v2092_v47 = vld [vmem:[%s3349_s3 + $0xa0] sm:$0xff] }
  0xa5   :  { %2463 = vmatpush3.msra.mxu0 %v876_v30  ;;  %2632 = vmatprep.mubr.msk.f32.mxu1 %vm992_vm2, %v980_v50  ;;  %v1079_v30 = vld [vmem:[%s3349_s3 + $0x18] sm:$0xff]  ;;  %v2090_v50 = vld [vmem:[%s3349_s3 + $0x90] sm:$0xff] }
  0xa6   :  { %2464 = vmatprep.subr.mxu0 %v891_v32  ;;  %v1077_v32 = vld [vmem:[%s3349_s3 + $0x8] sm:$0xff] }
  0xa7   :  { %2465 = vmatpush3.msra.mxu0 %v875_v33  ;;  %v2079_v33 = vld [vmem:[%s3349_s3 + $0x48] sm:$0xff] }
  0xa8   :  { %2466 = vmatprep.subr.mxu0 %v890_v34  ;;  %v1076_v34 = vld [vmem:[%s3349_s3] sm:$0xff] }
  0xa9   :  { %2467 = vmatpush3.msra.mxu0 %v874_v35  ;;  %v2078_v35 = vld [vmem:[%s3349_s3 + $0x40] sm:$0xff] }
  0xaa   :  { %2468 = vmatprep.subr.mxu0 %v889_v37  ;;  %v2095_v37 = vld [vmem:[%s3349_s3 + $0xb8] sm:$0xff] }
  0xab   :  { %2469 = vmatpush3.msra.mxu0 %v873_v38  ;;  %v2105_v38 = vld [vmem:[%s3349_s3 + $0xf8] sm:$0xff] }
  0xac   :  { %2470 = vmatprep.subr.mxu0 %v888_v39 }
  0xad   :  { %2471 = vmatpush3.msra.mxu0 %v872_v40 }
  0xae   :  { %969 = vmatmul.mubr.f32.vlgmr.msra.gmra.mxu0 %v2885_v54  ;;  %2654 = vmatprep.subr.mxu0 %v2085_v51 }
  0xaf   :  { %2655 = vmatpush3.msra.mxu0 %v2085_v51  ;;  %v2100_v51 = vld [vmem:[%s3349_s3 + $0xd0] sm:$0xff] }
  0xb0   :  { %2656 = vmatprep.subr.mxu0 %v2084_v53 }
  0xb1   :  { %2657 = vmatpush3.msra.mxu0 %v2084_v53  ;;  %v2099_v53 = vld [vmem:[%s3349_s3 + $0xc8] sm:$0xff] }
  0xb2   :  { %2658 = vmatprep.subr.mxu0 %v2083_v57 }
  0xb3   :  { %2659 = vmatpush3.msra.mxu0 %v2083_v57  ;;  %v2115_v57 = vld [vmem:[%s3349_s3 + $0x138] sm:$0xff] }
  0xb4   :  { %2660 = vmatprep.subr.mxu0 %v2082_v58 }
  0xb5   :  { %2661 = vmatpush3.msra.mxu0 %v2082_v58  ;;  %v2125_v58 = vld [vmem:[%s3349_s3 + $0x178] sm:$0xff] }
  0xb6   :  { %2662 = vmatprep.subr.mxu0 %v2081_v59 }
  0xb7   :  { %2663 = vmatpush3.msra.mxu0 %v2081_v59  ;;  %v2114_v59 = vld [vmem:[%s3349_s3 + $0x130] sm:$0xff] }
  0xb8   :  { %2664 = vmatprep.subr.mxu0 %v2080_v60 }
  0xb9   :  { %2665 = vmatpush3.msra.mxu0 %v2080_v60  ;;  %v2124_v60 = vld [vmem:[%s3349_s3 + $0x170] sm:$0xff] }
  0xba   :  { %2666 = vmatprep.subr.mxu0 %v2079_v33 }
  0xbb   :  { %2667 = vmatpush3.msra.mxu0 %v2079_v33  ;;  %v1884_v33 = vld [vmem:[%s3348_s2 + $0xe8] sm:$0xff] }
  0xbc   :  { %2668 = vmatprep.subr.mxu0 %v2078_v35 }
  0xbd   :  { %2669 = vmatpush3.msra.mxu0 %v2078_v35  ;;  %v2152_v35 = vld [vmem:[%s3349_s3 + $0x220] sm:$0xff] }
  0xbe   :  { %2692 = vmatprep.subr.mxu0 %v2105_v38 }
  0xee   :  { %v2192_v42 = vpop.f32.mrf.mxu0 }
  0xf0   :  { %v2193_v43 = vpop.f32.mrf.mxu0 }
  0xf1   :  { %v2194_v46 = vadd.f32 %v2193_v43, %v2192_v42  ;;  %v2094_v42 = vld [vmem:[%s3349_s3 + $0xb0] sm:$0xff] }
  0xf2   :  { %v2104_v43 = vld [vmem:[%s3349_s3 + $0xf0] sm:$0xff] }
  0xf3   :  { %142 = vst.msk [vmem:[#allocation2] sm:$0xff] %vm141_vm1, %v2194_v46  ;;  %v2103_v46 = vld [vmem:[%s3349_s3 + $0xe8] sm:$0xff] }
  0xf7   :  { %v2227_v54 = vpop.f32.mrf.mxu1 }
  0xf9   :  { %v2228_v48 = vpop.f32.mrf.mxu1 }
  0xfa   :  { %v2229_v49 = vadd.f32 %v2228_v48, %v2227_v54  ;;  %v982_v24 = vld [vmem:[#allocation2] sm:$0xff]  ;;  %v2091_v48 = vld [vmem:[%s3349_s3 + $0x98] sm:$0xff] }
  0xfb   :  { %v2102_v54 = vld [vmem:[%s3349_s3 + $0xe0] sm:$0xff] }
  0xfc   :  { %246 = vst.msk [vmem:[#allocation2 + $0x8] sm:$0xff] %vm141_vm1, %v2229_v49  ;;  %v2101_v49 = vld [vmem:[%s3349_s3 + $0xd8] sm:$0xff] }
 0x103   :  { %v983_v23 = vld [vmem:[#allocation2 + $0x8] sm:$0xff] }
 0x10e   :  { %v2262_v52 = vpop.f32.mrf.mxu0 }
 0x110   :  { %v2263_v55 = vpop.f32.mrf.mxu0 }
 0x111   :  { %v2264_v56 = vadd.f32 %v2263_v55, %v2262_v52  ;;  %v2089_v52 = vld [vmem:[%s3349_s3 + $0x88] sm:$0xff]  ;;  %v2088_v55 = vld [vmem:[%s3349_s3 + $0x80] sm:$0xff] }
 0x113   :  { %350 = vst.msk [vmem:[#allocation2 + $0x10] sm:$0xff] %vm141_vm1, %v2264_v56  ;;  %v2098_v56 = vld [vmem:[%s3349_s3 + $0xc0] sm:$0xff] }
 0x11a   :  { %v984_v22 = vld [vmem:[#allocation2 + $0x10] sm:$0xff] }
 0x11b   :  { %v2297_v61 = vpop.f32.mrf.mxu1 }
 0x11d   :  { %v2298_v62 = vpop.f32.mrf.mxu1 }
 0x11e   :  { %v2299_v63 = vadd.f32 %v2298_v62, %v2297_v61  ;;  %v2113_v61 = vld [vmem:[%s3349_s3 + $0x128] sm:$0xff] }
 0x11f   :  { %v2123_v62 = vld [vmem:[%s3349_s3 + $0x168] sm:$0xff] }
 0x120   :  { %454 = vst.msk [vmem:[#allocation2 + $0x18] sm:$0xff] %vm141_vm1, %v2299_v63  ;;  %v2112_v63 = vld [vmem:[%s3349_s3 + $0x120] sm:$0xff] }
 0x127   :  { %v985_v21 = vld [vmem:[#allocation2 + $0x18] sm:$0xff] }
 0x12e   :  { %v2332_v0 = vpop.f32.mrf.mxu0 }
 0x130   :  { %v2333_v1 = vpop.f32.mrf.mxu0 }
 0x131   :  { %v2334_v2 = vadd.f32 %v2333_v1, %v2332_v0  ;;  %v2122_v0 = vld [vmem:[%s3349_s3 + $0x160] sm:$0xff]  ;;  %v2111_v1 = vld [vmem:[%s3349_s3 + $0x118] sm:$0xff] }
 0x133   :  { %558 = vst.msk [vmem:[#allocation2 + $0x20] sm:$0xff] %vm141_vm1, %v2334_v2  ;;  %v2121_v2 = vld [vmem:[%s3349_s3 + $0x158] sm:$0xff] }
 0x13a   :  { %v986_v20 = vld [vmem:[#allocation2 + $0x20] sm:$0xff] }
 0x13f   :  { %v2367_v3 = vpop.f32.mrf.mxu1 }
 0x141   :  { %v2368_v4 = vpop.f32.mrf.mxu1 }
 0x142   :  { %v2369_v5 = vadd.f32 %v2368_v4, %v2367_v3  ;;  %v2110_v3 = vld [vmem:[%s3349_s3 + $0x110] sm:$0xff] }
 0x143   :  { %v2120_v4 = vld [vmem:[%s3349_s3 + $0x150] sm:$0xff] }
 0x144   :  { %662 = vst.msk [vmem:[#allocation2 + $0x28] sm:$0xff] %vm141_vm1, %v2369_v5  ;;  %v2109_v5 = vld [vmem:[%s3349_s3 + $0x108] sm:$0xff] }
 0x14b   :  { %v987_v19 = vld [vmem:[#allocation2 + $0x28] sm:$0xff] }
 0x14e   :  { %v2402_v6 = vpop.f32.mrf.mxu0 }
 0x150   :  { %v2403_v7 = vpop.f32.mrf.mxu0 }
 0x151   :  { %v2404_v8 = vadd.f32 %v2403_v7, %v2402_v6  ;;  %v2119_v6 = vld [vmem:[%s3349_s3 + $0x148] sm:$0xff]  ;;  %v2108_v7 = vld [vmem:[%s3349_s3 + $0x100] sm:$0xff] }
 0x153   :  { %766 = vst.msk [vmem:[#allocation2 + $0x30] sm:$0xff] %vm141_vm1, %v2404_v8  ;;  %v2118_v8 = vld [vmem:[%s3349_s3 + $0x140] sm:$0xff] }
 0x15a   :  { %v988_v18 = vld [vmem:[#allocation2 + $0x30] sm:$0xff] }
 0x162   :  { %v2437_v9 = vpop.f32.mrf.mxu1 }
 0x164   :  { %v2438_v10 = vpop.f32.mrf.mxu1 }
 0x165   :  { %v2439_v11 = vadd.f32 %v2438_v10, %v2437_v9  ;;  %v2135_v9 = vld [vmem:[%s3349_s3 + $0x1b8] sm:$0xff] }
 0x166   :  { %v2145_v10 = vld [vmem:[%s3349_s3 + $0x1f8] sm:$0xff] }
 0x167   :  { %870 = vst.msk [vmem:[#allocation2 + $0x38] sm:$0xff] %vm141_vm1, %v2439_v11  ;;  %v2134_v11 = vld [vmem:[%s3349_s3 + $0x1b0] sm:$0xff] }
 0x16e   :  { %v2472_v12 = vpop.f32.mrf.mxu0  ;;  %v989_v17 = vld [vmem:[#allocation2 + $0x38] sm:$0xff] }
 0x170   :  { %v2473_v14 = vpop.f32.mrf.mxu0 }
 0x171   :  { %v2474_v15 = vadd.f32 %v2473_v14, %v2472_v12  ;;  %v2144_v12 = vld [vmem:[%s3349_s3 + $0x1f0] sm:$0xff]  ;;  %v2133_v14 = vld [vmem:[%s3349_s3 + $0x1a8] sm:$0xff] }
 0x173   :  { %974 = vst.msk [vmem:[#allocation2 + $0x40] sm:$0xff] %vm141_vm1, %v2474_v15  ;;  %v2143_v15 = vld [vmem:[%s3349_s3 + $0x1e8] sm:$0xff] }
 0x17a   :  { %v990_v16 = vld [vmem:[#allocation2 + $0x40] sm:$0xff] }
 0x17b   :  { %2614 = vmatprep.subr.mxu1 %v990_v16 }
 0x17c   :  { %2615 = vmatpush3.msra.mxu1 %v990_v16  ;;  %v2132_v16 = vld [vmem:[%s3349_s3 + $0x1a0] sm:$0xff] }
 0x17d   :  { %2616 = vmatprep.subr.mxu1 %v989_v17 }
 0x17e   :  { %2617 = vmatpush3.msra.mxu1 %v989_v17  ;;  %v2142_v17 = vld [vmem:[%s3349_s3 + $0x1e0] sm:$0xff] }
 0x17f   :  { %2618 = vmatprep.subr.mxu1 %v988_v18 }
 0x180   :  { %2619 = vmatpush3.msra.mxu1 %v988_v18  ;;  %v2131_v18 = vld [vmem:[%s3349_s3 + $0x198] sm:$0xff] }
 0x181   :  { %2620 = vmatprep.subr.mxu1 %v987_v19 }
 0x182   :  { %2621 = vmatpush3.msra.mxu1 %v987_v19  ;;  %v2141_v19 = vld [vmem:[%s3349_s3 + $0x1d8] sm:$0xff] }
 0x183   :  { %2622 = vmatprep.subr.mxu1 %v986_v20 }
 0x184   :  { %2623 = vmatpush3.msra.mxu1 %v986_v20  ;;  %v2130_v20 = vld [vmem:[%s3349_s3 + $0x190] sm:$0xff] }
 0x185   :  { %2624 = vmatprep.subr.mxu1 %v985_v21 }
 0x186   :  { %2625 = vmatpush3.msra.mxu1 %v985_v21  ;;  %v2140_v21 = vld [vmem:[%s3349_s3 + $0x1d0] sm:$0xff] }
 0x187   :  { %2626 = vmatprep.subr.mxu1 %v984_v22 }
 0x188   :  { %2627 = vmatpush3.msra.mxu1 %v984_v22  ;;  %v2129_v22 = vld [vmem:[%s3349_s3 + $0x188] sm:$0xff] }
 0x189   :  { %2628 = vmatprep.subr.mxu1 %v983_v23 }
 0x18a   :  { %2629 = vmatpush3.msra.mxu1 %v983_v23  ;;  %v2139_v23 = vld [vmem:[%s3349_s3 + $0x1c8] sm:$0xff] }
 0x18b   :  { %2630 = vmatprep.subr.mxu1 %v982_v24 }
 0x18c   :  { %2631 = vmatpush3.msra.mxu1 %v982_v24  ;;  %v2128_v24 = vld [vmem:[%s3349_s3 + $0x180] sm:$0xff] }
 0x18d   :  { %2633 = vmatmul.mubr.msk.f32.vlgmr.msra.gmra.mxu1 %vm992_vm2, %v981_v25  ;;  %2635 = vmatprep.subr.mxu1 %v1083_v26  ;;  %v2138_v25 = vld [vmem:[%s3349_s3 + $0x1c0] sm:$0xff] }
 0x18e   :  { %2636 = vmatpush3.msra.mxu1 %v1083_v26  ;;  %v2155_v26 = vld [vmem:[%s3349_s3 + $0x238] sm:$0xff] }
 0x18f   :  { %2637 = vmatprep.subr.mxu1 %v1082_v27 }
 0x190   :  { %2638 = vmatpush3.msra.mxu1 %v1082_v27  ;;  %v1886_v27 = vld [vmem:[%s3348_s2 + $0xf8] sm:$0xff] }
 0x191   :  { %2639 = vmatprep.subr.mxu1 %v1081_v28 }
 0x192   :  { %2640 = vmatpush3.msra.mxu1 %v1081_v28  ;;  %v1870_v28 = vld [vmem:[%s3348_s2 + $0x78] sm:$0xff] }
 0x193   :  { %2641 = vmatprep.subr.mxu1 %v1080_v29 }
 0x194   :  { %2642 = vmatpush3.msra.mxu1 %v1080_v29  ;;  %v2154_v29 = vld [vmem:[%s3349_s3 + $0x230] sm:$0xff] }
 0x195   :  { %2643 = vmatprep.subr.mxu1 %v1079_v30 }
 0x196   :  { %2644 = vmatpush3.msra.mxu1 %v1079_v30  ;;  %v1885_v30 = vld [vmem:[%s3348_s2 + $0xf0] sm:$0xff] }
 0x197   :  { %2645 = vmatprep.subr.mxu1 %v1078_v31 }
 0x198   :  { %2646 = vmatpush3.msra.mxu1 %v1078_v31  ;;  %v1869_v31 = vld [vmem:[%s3348_s2 + $0x70] sm:$0xff] }
 0x199   :  { %2647 = vmatprep.subr.mxu1 %v1077_v32 }
 0x19a   :  { %2648 = vmatpush3.msra.mxu1 %v1077_v32  ;;  %v2153_v32 = vld [vmem:[%s3349_s3 + $0x228] sm:$0xff] }
 0x19b   :  { %2649 = vmatprep.subr.mxu1 %v1076_v34 }
 0x19c   :  { %2650 = vmatpush3.msra.mxu1 %v1076_v34  ;;  %v1868_v34 = vld [vmem:[%s3348_s2 + $0x68] sm:$0xff] }
 0x19d   :  { %2673 = vmatprep.subr.mxu1 %v2095_v37 }
 0x24d   :  { %v2634_v39 = vpop.f32.mrf.mxu1 }
 0x24e   :  { %v2985_v13 = vmax.f32 %v2634_v39, 0.0  ;;  %v2151_v39 = vld [vmem:[%s3349_s3 + $0x218] sm:$0xff] }
 0x24f   :  { %v1065_v40 = vpop.f32.mrf.mxu1 }
 0x250   :  { %v2983_v41 = vmax.f32 %v1065_v40, 0.0  ;;  %v1882_v40 = vld [vmem:[%s3348_s2 + $0xd8] sm:$0xff] }
 0x252   :  { %2651 = vmatprep.mubr.msk.f32.mxu1 %vm141_vm1, %v2983_v41  ;;  %2670 = vmatprep.mubr.msk.f32.mxu0 %vm141_vm1, %v2983_v41 }
 0x253   :  { %2652 = vmatmul.mubr.msk.f32.vlgmr.msra.gmra.mxu1 %vm141_vm1, %v2985_v13  ;;  %2671 = vmatmul.mubr.msk.f32.vlgmr.msra.gmra.mxu0 %vm141_vm1, %v2985_v13 }
 0x254   :  { %2674 = vmatpush3.msra.mxu1 %v2095_v37  ;;  %2693 = vmatpush3.msra.mxu0 %v2105_v38  ;;  %v1883_v37 = vld [vmem:[%s3348_s2 + $0xe0] sm:$0xff] }
 0x255   :  { %2675 = vmatprep.subr.mxu1 %v2094_v42  ;;  %2689 = vmatprep.mubr.msk.f32.mxu1 %vm141_vm1, %v2983_v41  ;;  %v1867_v38 = vld [vmem:[%s3348_s2 + $0x60] sm:$0xff] }
 0x256   :  { %2694 = vmatprep.subr.mxu0 %v2104_v43  ;;  %2708 = vmatprep.mubr.msk.f32.mxu0 %vm141_vm1, %v2983_v41 }
 0x257   :  { %2676 = vmatpush3.msra.mxu1 %v2094_v42  ;;  %2695 = vmatpush3.msra.mxu0 %v2104_v43  ;;  %v2150_v42 = vld [vmem:[%s3349_s3 + $0x210] sm:$0xff] }
 0x258   :  { %2677 = vmatprep.subr.mxu1 %v2093_v45  ;;  %2696 = vmatprep.subr.mxu0 %v2103_v46  ;;  %v1881_v43 = vld [vmem:[%s3348_s2 + $0xd0] sm:$0xff] }
 0x259   :  { %2678 = vmatpush3.msra.mxu1 %v2093_v45  ;;  %2697 = vmatpush3.msra.mxu0 %v2103_v46  ;;  %v1865_v45 = vld [vmem:[%s3348_s2 + $0x50] sm:$0xff]  ;;  %v2149_v46 = vld [vmem:[%s3349_s3 + $0x208] sm:$0xff] }
 0x25a   :  { %2679 = vmatprep.subr.mxu1 %v2092_v47  ;;  %2698 = vmatprep.subr.mxu0 %v2102_v54 }
 0x25b   :  { %2680 = vmatpush3.msra.mxu1 %v2092_v47  ;;  %2699 = vmatpush3.msra.mxu0 %v2102_v54  ;;  %v1880_v47 = vld [vmem:[%s3348_s2 + $0xc8] sm:$0xff] }
 0x25c   :  { %2681 = vmatprep.subr.mxu1 %v2091_v48  ;;  %2700 = vmatprep.subr.mxu0 %v2101_v49  ;;  %v1864_v54 = vld [vmem:[%s3348_s2 + $0x48] sm:$0xff] }
 0x25d   :  { %2682 = vmatpush3.msra.mxu1 %v2091_v48  ;;  %2701 = vmatpush3.msra.mxu0 %v2101_v49  ;;  %v2148_v48 = vld [vmem:[%s3349_s3 + $0x200] sm:$0xff] }
 0x25e   :  { %2683 = vmatprep.subr.mxu1 %v2090_v50  ;;  %2702 = vmatprep.subr.mxu0 %v2100_v51  ;;  %v1879_v49 = vld [vmem:[%s3348_s2 + $0xc0] sm:$0xff] }
 0x25f   :  { %2684 = vmatpush3.msra.mxu1 %v2090_v50  ;;  %2703 = vmatpush3.msra.mxu0 %v2100_v51  ;;  %v1863_v50 = vld [vmem:[%s3348_s2 + $0x40] sm:$0xff]  ;;  %v1878_v51 = vld [vmem:[%s3348_s2 + $0xb8] sm:$0xff] }
 0x260   :  { %2685 = vmatprep.subr.mxu1 %v2089_v52  ;;  %2704 = vmatprep.subr.mxu0 %v2099_v53 }
 0x261   :  { %2686 = vmatpush3.msra.mxu1 %v2089_v52  ;;  %2705 = vmatpush3.msra.mxu0 %v2099_v53  ;;  %v1862_v52 = vld [vmem:[%s3348_s2 + $0x38] sm:$0xff]  ;;  %v1877_v53 = vld [vmem:[%s3348_s2 + $0xb0] sm:$0xff] }
 0x262   :  { %2687 = vmatprep.subr.mxu1 %v2088_v55  ;;  %2706 = vmatprep.subr.mxu0 %v2098_v56 }
 0x263   :  { %2688 = vmatpush3.msra.mxu1 %v2088_v55  ;;  %2707 = vmatpush3.msra.mxu0 %v2098_v56  ;;  %v1861_v55 = vld [vmem:[%s3348_s2 + $0x30] sm:$0xff]  ;;  %v1876_v56 = vld [vmem:[%s3348_s2 + $0xa8] sm:$0xff] }
 0x264   :  { %2690 = vmatmul.mubr.msk.f32.vlgmr.msra.gmra.mxu1 %vm141_vm1, %v2985_v13  ;;  %2709 = vmatmul.mubr.msk.f32.vlgmr.msra.gmra.mxu0 %vm141_vm1, %v2985_v13 }
 0x265   :  { %2711 = vmatprep.subr.mxu1 %v2115_v57  ;;  %2730 = vmatprep.subr.mxu0 %v2125_v58 }
 0x266   :  { %2712 = vmatpush3.msra.mxu1 %v2115_v57  ;;  %2727 = vmatprep.mubr.msk.f32.mxu1 %vm141_vm1, %v2983_v41  ;;  %v1875_v57 = vld [vmem:[%s3348_s2 + $0xa0] sm:$0xff] }
 0x267   :  { %2731 = vmatpush3.msra.mxu0 %v2125_v58  ;;  %2746 = vmatprep.mubr.msk.f32.mxu0 %vm141_vm1, %v2983_v41  ;;  %v1874_v58 = vld [vmem:[%s3348_s2 + $0x98] sm:$0xff] }
 0x268   :  { %2713 = vmatprep.subr.mxu1 %v2114_v59  ;;  %2732 = vmatprep.subr.mxu0 %v2124_v60 }
 0x269   :  { %2714 = vmatpush3.msra.mxu1 %v2114_v59  ;;  %2733 = vmatpush3.msra.mxu0 %v2124_v60  ;;  %v1858_v59 = vld [vmem:[%s3348_s2 + $0x18] sm:$0xff]  ;;  %v1873_v60 = vld [vmem:[%s3348_s2 + $0x90] sm:$0xff] }
 0x26a   :  { %2715 = vmatprep.subr.mxu1 %v2113_v61  ;;  %2734 = vmatprep.subr.mxu0 %v2123_v62 }
 0x26b   :  { %2716 = vmatpush3.msra.mxu1 %v2113_v61  ;;  %2735 = vmatpush3.msra.mxu0 %v2123_v62  ;;  %v1857_v61 = vld [vmem:[%s3348_s2 + $0x10] sm:$0xff]  ;;  %v1872_v62 = vld [vmem:[%s3348_s2 + $0x88] sm:$0xff] }
 0x26c   :  { %2717 = vmatprep.subr.mxu1 %v2112_v63  ;;  %2736 = vmatprep.subr.mxu0 %v2122_v0 }
 0x26d   :  { %2718 = vmatpush3.msra.mxu1 %v2112_v63  ;;  %2737 = vmatpush3.msra.mxu0 %v2122_v0  ;;  %v1856_v63 = vld [vmem:[%s3348_s2 + $0x8] sm:$0xff]  ;;  %v1871_v0 = vld [vmem:[%s3348_s2 + $0x80] sm:$0xff] }
 0x26e   :  { %2719 = vmatprep.subr.mxu1 %v2111_v1  ;;  %2738 = vmatprep.subr.mxu0 %v2121_v2 }
 0x26f   :  { %2720 = vmatpush3.msra.mxu1 %v2111_v1  ;;  %2739 = vmatpush3.msra.mxu0 %v2121_v2  ;;  %v1855_v1 = vld [vmem:[%s3348_s2] sm:$0xff] }
 0x270   :  { %2721 = vmatprep.subr.mxu1 %v2110_v3  ;;  %2740 = vmatprep.subr.mxu0 %v2120_v4  ;;  %v2811_v2 = vld [vmem:[%s3346_s0] sm:$0xff] }
 0x271   :  { %2722 = vmatpush3.msra.mxu1 %v2110_v3  ;;  %2741 = vmatpush3.msra.mxu0 %v2120_v4  ;;  %v1960_v3 = vld [vmem:[%s3351_s5 + $0x8] sm:$0xff] }
 0x272   :  { %2723 = vmatprep.subr.mxu1 %v2109_v5  ;;  %2742 = vmatprep.subr.mxu0 %v2119_v6 }
 0x273   :  { %2724 = vmatpush3.msra.mxu1 %v2109_v5  ;;  %2743 = vmatpush3.msra.mxu0 %v2119_v6 }
 0x274   :  { %2725 = vmatprep.subr.mxu1 %v2108_v7  ;;  %2744 = vmatprep.subr.mxu0 %v2118_v8 }
 0x275   :  { %2726 = vmatpush3.msra.mxu1 %v2108_v7  ;;  %2745 = vmatpush3.msra.mxu0 %v2118_v8 }
 0x276   :  { %2728 = vmatmul.mubr.msk.f32.vlgmr.msra.gmra.mxu1 %vm141_vm1, %v2985_v13  ;;  %2747 = vmatmul.mubr.msk.f32.vlgmr.msra.gmra.mxu0 %vm141_vm1, %v2985_v13 }
 0x277   :  { %2749 = vmatprep.subr.mxu1 %v2135_v9  ;;  %2768 = vmatprep.subr.mxu0 %v2145_v10 }
 0x278   :  { %2750 = vmatpush3.msra.mxu1 %v2135_v9  ;;  %2765 = vmatprep.mubr.msk.f32.mxu1 %vm141_vm1, %v2983_v41 }
 0x279   :  { %2769 = vmatpush3.msra.mxu0 %v2145_v10  ;;  %2784 = vmatprep.mubr.msk.f32.mxu0 %vm141_vm1, %v2983_v41 }
 0x27a   :  { %2751 = vmatprep.subr.mxu1 %v2134_v11  ;;  %2770 = vmatprep.subr.mxu0 %v2144_v12 }
 0x27b   :  { %2752 = vmatpush3.msra.mxu1 %v2134_v11  ;;  %2771 = vmatpush3.msra.mxu0 %v2144_v12 }
 0x27c   :  { %2753 = vmatprep.subr.mxu1 %v2133_v14  ;;  %2772 = vmatprep.subr.mxu0 %v2143_v15 }
 0x27d   :  { %2754 = vmatpush3.msra.mxu1 %v2133_v14  ;;  %2773 = vmatpush3.msra.mxu0 %v2143_v15 }
 0x27e   :  { %2755 = vmatprep.subr.mxu1 %v2132_v16  ;;  %2774 = vmatprep.subr.mxu0 %v2142_v17 }
 0x27f   :  { %2756 = vmatpush3.msra.mxu1 %v2132_v16  ;;  %2775 = vmatpush3.msra.mxu0 %v2142_v17 }
 0x280   :  { %2757 = vmatprep.subr.mxu1 %v2131_v18  ;;  %2776 = vmatprep.subr.mxu0 %v2141_v19 }
 0x281   :  { %2758 = vmatpush3.msra.mxu1 %v2131_v18  ;;  %2777 = vmatpush3.msra.mxu0 %v2141_v19 }
 0x282   :  { %2759 = vmatprep.subr.mxu1 %v2130_v20  ;;  %2778 = vmatprep.subr.mxu0 %v2140_v21 }
 0x283   :  { %2760 = vmatpush3.msra.mxu1 %v2130_v20  ;;  %2779 = vmatpush3.msra.mxu0 %v2140_v21 }
 0x284   :  { %2761 = vmatprep.subr.mxu1 %v2129_v22  ;;  %2780 = vmatprep.subr.mxu0 %v2139_v23 }
 0x285   :  { %2762 = vmatpush3.msra.mxu1 %v2129_v22  ;;  %2781 = vmatpush3.msra.mxu0 %v2139_v23 }
 0x286   :  { %2763 = vmatprep.subr.mxu1 %v2128_v24  ;;  %2782 = vmatprep.subr.mxu0 %v2138_v25 }
 0x287   :  { %2764 = vmatpush3.msra.mxu1 %v2128_v24  ;;  %2783 = vmatpush3.msra.mxu0 %v2138_v25 }
 0x288   :  { %2766 = vmatmul.mubr.msk.f32.vlgmr.msra.gmra.mxu1 %vm141_vm1, %v2985_v13  ;;  %2785 = vmatmul.mubr.msk.f32.vlgmr.msra.gmra.mxu0 %vm141_vm1, %v2985_v13 }
 0x289   :  { %2787 = vmatprep.subr.mxu1 %v2155_v26  ;;  %2577 = vmatprep.subr.mxu0 %v1886_v27 }
 0x28a   :  { %2788 = vmatpush3.msra.mxu1 %v2155_v26  ;;  %2803 = vmatprep.mubr.msk.f32.mxu1 %vm141_vm1, %v2983_v41  ;;  %v1866_v41 = vld [vmem:[%s3348_s2 + $0x58] sm:$0xff] }
 0x28b   :  { %2578 = vmatpush3.msra.mxu0 %v1870_v28  ;;  %2789 = vmatprep.subr.mxu1 %v2154_v29 }
 0x28c   :  { %2579 = vmatprep.subr.mxu0 %v1885_v30  ;;  %2790 = vmatpush3.msra.mxu1 %v2154_v29 }
 0x28d   :  { %2580 = vmatpush3.msra.mxu0 %v1869_v31  ;;  %2791 = vmatprep.subr.mxu1 %v2153_v32 }
 0x28e   :  { %2581 = vmatprep.subr.mxu0 %v1884_v33  ;;  %2792 = vmatpush3.msra.mxu1 %v2153_v32 }
 0x28f   :  { %2582 = vmatpush3.msra.mxu0 %v1868_v34  ;;  %2793 = vmatprep.subr.mxu1 %v2152_v35 }
 0x290   :  { %2583 = vmatprep.subr.mxu0 %v1883_v37  ;;  %2794 = vmatpush3.msra.mxu1 %v2152_v35 }
 0x291   :  { %2584 = vmatpush3.msra.mxu0 %v1867_v38  ;;  %2795 = vmatprep.subr.mxu1 %v2151_v39 }
 0x292   :  { %2585 = vmatprep.subr.mxu0 %v1882_v40  ;;  %2796 = vmatpush3.msra.mxu1 %v2151_v39 }
 0x293   :  { %2586 = vmatpush3.msra.mxu0 %v1866_v41  ;;  %2797 = vmatprep.subr.mxu1 %v2150_v42 }
 0x294   :  { %2587 = vmatprep.subr.mxu0 %v1881_v43  ;;  %2798 = vmatpush3.msra.mxu1 %v2150_v42  ;;  %v1982_v43 = vld [vmem:[#allocation3 + $0x98] sm:$0xff] }
 0x295   :  { %2588 = vmatpush3.msra.mxu0 %v1865_v45  ;;  %2799 = vmatprep.subr.mxu1 %v2149_v46 }
 0x296   :  { %2589 = vmatprep.subr.mxu0 %v1880_v47  ;;  %2800 = vmatpush3.msra.mxu1 %v2149_v46  ;;  %v1959_v47 = vld [vmem:[%s3351_s5] sm:$0xff] }
 0x297   :  { %2590 = vmatpush3.msra.mxu0 %v1864_v54  ;;  %2801 = vmatprep.subr.mxu1 %v2148_v48 }
 0x298   :  { %2591 = vmatprep.subr.mxu0 %v1879_v49  ;;  %2802 = vmatpush3.msra.mxu1 %v2148_v48  ;;  %v1962_v48 = vld [vmem:[%s3351_s5 + $0x18] sm:$0xff]  ;;  %v1961_v49 = vld [vmem:[%s3351_s5 + $0x10] sm:$0xff] }
 0x299   :  { %2592 = vmatpush3.msra.mxu0 %v1863_v50  ;;  %2804 = vmatmul.mubr.msk.f32.vlgmr.msra.gmra.mxu1 %vm141_vm1, %v2985_v13  ;;  %v1860_v13 = vld [vmem:[%s3348_s2 + $0x28] sm:$0xff] }
 0x29a   :  { %2593 = vmatprep.subr.mxu0 %v1878_v51  ;;  %1951 = vmatprep.mubr.f32.mxu0 %v2903_v36  ;;  %v1859_v36 = vld [vmem:[%s3348_s2 + $0x20] sm:$0xff] }
 0x29b   :  { %2594 = vmatpush3.msra.mxu0 %v1862_v52  ;;  %1990 = vmatprep.subr.mxu1 %v2837_v44 }
 0x29c   :  { %2595 = vmatprep.subr.mxu0 %v1877_v53  ;;  %2158 = vmatprep.mubr.msk.f32.mxu1 %vm1983_vm3, %v1960_v3 }
 0x29d   :  { %2596 = vmatpush3.msra.mxu0 %v1861_v55 }
 0x29e   :  { %2597 = vmatprep.subr.mxu0 %v1876_v56 }
 0x29f   :  { %2598 = vmatpush3.msra.mxu0 %v1860_v13 }
 0x2a0   :  { %2599 = vmatprep.subr.mxu0 %v1875_v57 }
 0x2a1   :  { %2600 = vmatpush3.msra.mxu0 %v1859_v36 }
 0x2a2   :  { %2601 = vmatprep.subr.mxu0 %v1874_v58 }
 0x2a3   :  { %2602 = vmatpush3.msra.mxu0 %v1858_v59 }
 0x2a4   :  { %2603 = vmatprep.subr.mxu0 %v1873_v60 }
 0x2a5   :  { %2604 = vmatpush3.msra.mxu0 %v1857_v61 }
 0x2a6   :  { %2605 = vmatprep.subr.mxu0 %v1872_v62 }
 0x2a7   :  { %2606 = vmatpush3.msra.mxu0 %v1856_v63 }
 0x2a8   :  { %2607 = vmatprep.subr.mxu0 %v1871_v0 }
 0x2a9   :  { %2608 = vmatpush3.msra.mxu0 %v1855_v1 }
 0x2aa   :  { %1952 = vmatmul.mubr.f32.vlgmr.msra.gmra.mxu0 %v2811_v2 }
 0x313   :  { %v2653_v4 = vpop.f32.mrf.mxu1  ;;  %v2672_v5 = vpop.f32.mrf.mxu0 }
 0x314   :  { %1166 = vst.msk [vmem:[#allocation3 + $0x8] sm:$0xff] %vm141_vm1, %v2653_v4  ;;  %1252 = vst.msk [vmem:[#allocation3 + $0x18] sm:$0xff] %vm141_vm1, %v2672_v5 }
 0x315   :  { %v1156_v6 = vpop.f32.mrf.mxu1  ;;  %v1242_v7 = vpop.f32.mrf.mxu0 }
 0x316   :  { %1165 = vst.msk [vmem:[#allocation3] sm:$0xff] %vm141_vm1, %v1156_v6  ;;  %1251 = vst.msk [vmem:[#allocation3 + $0x10] sm:$0xff] %vm141_vm1, %v1242_v7 }
 0x31b   :  { %v1966_v35 = vld [vmem:[#allocation3 + $0x18] sm:$0xff]  ;;  %v1964_v40 = vld [vmem:[#allocation3 + $0x8] sm:$0xff] }
 0x31d   :  { %v1965_v38 = vld [vmem:[#allocation3 + $0x10] sm:$0xff]  ;;  %v1963_v42 = vld [vmem:[#allocation3] sm:$0xff] }
 0x324   :  { %v2691_v8 = vpop.f32.mrf.mxu1  ;;  %v2710_v9 = vpop.f32.mrf.mxu0 }
 0x325   :  { %1338 = vst.msk [vmem:[#allocation3 + $0x28] sm:$0xff] %vm141_vm1, %v2691_v8  ;;  %1424 = vst.msk [vmem:[#allocation3 + $0x38] sm:$0xff] %vm141_vm1, %v2710_v9 }
 0x326   :  { %v1328_v10 = vpop.f32.mrf.mxu1  ;;  %v1414_v11 = vpop.f32.mrf.mxu0 }
 0x327   :  { %1337 = vst.msk [vmem:[#allocation3 + $0x20] sm:$0xff] %vm141_vm1, %v1328_v10  ;;  %1423 = vst.msk [vmem:[#allocation3 + $0x30] sm:$0xff] %vm141_vm1, %v1414_v11 }
 0x32c   :  { %v1970_v31 = vld [vmem:[#allocation3 + $0x38] sm:$0xff]  ;;  %v1968_v33 = vld [vmem:[#allocation3 + $0x28] sm:$0xff] }
 0x32e   :  { %v1969_v32 = vld [vmem:[#allocation3 + $0x30] sm:$0xff]  ;;  %v1967_v34 = vld [vmem:[#allocation3 + $0x20] sm:$0xff] }
 0x336   :  { %v2729_v12 = vpop.f32.mrf.mxu1  ;;  %v2748_v14 = vpop.f32.mrf.mxu0 }
 0x337   :  { %1510 = vst.msk [vmem:[#allocation3 + $0x48] sm:$0xff] %vm141_vm1, %v2729_v12  ;;  %1596 = vst.msk [vmem:[#allocation3 + $0x58] sm:$0xff] %vm141_vm1, %v2748_v14 }
 0x338   :  { %v1500_v15 = vpop.f32.mrf.mxu1  ;;  %v1586_v16 = vpop.f32.mrf.mxu0 }
 0x339   :  { %1509 = vst.msk [vmem:[#allocation3 + $0x40] sm:$0xff] %vm141_vm1, %v1500_v15  ;;  %1595 = vst.msk [vmem:[#allocation3 + $0x50] sm:$0xff] %vm141_vm1, %v1586_v16 }
 0x33e   :  { %v1974_v25 = vld [vmem:[#allocation3 + $0x58] sm:$0xff]  ;;  %v1972_v29 = vld [vmem:[#allocation3 + $0x48] sm:$0xff] }
 0x340   :  { %v1973_v27 = vld [vmem:[#allocation3 + $0x50] sm:$0xff]  ;;  %v1971_v30 = vld [vmem:[#allocation3 + $0x40] sm:$0xff] }
 0x348   :  { %v2767_v17 = vpop.f32.mrf.mxu1  ;;  %v2786_v18 = vpop.f32.mrf.mxu0 }
 0x349   :  { %1682 = vst.msk [vmem:[#allocation3 + $0x68] sm:$0xff] %vm141_vm1, %v2767_v17  ;;  %1768 = vst.msk [vmem:[#allocation3 + $0x78] sm:$0xff] %vm141_vm1, %v2786_v18 }
 0x34a   :  { %v1672_v19 = vpop.f32.mrf.mxu1  ;;  %v1758_v20 = vpop.f32.mrf.mxu0 }
 0x34b   :  { %1681 = vst.msk [vmem:[#allocation3 + $0x60] sm:$0xff] %vm141_vm1, %v1672_v19  ;;  %1767 = vst.msk [vmem:[#allocation3 + $0x70] sm:$0xff] %vm141_vm1, %v1758_v20 }
 0x350   :  { %v1978_v21 = vld [vmem:[#allocation3 + $0x78] sm:$0xff]  ;;  %v1976_v23 = vld [vmem:[#allocation3 + $0x68] sm:$0xff] }
 0x351   :  { %1991 = vmatpush1.msra.mxu1 %v1978_v21 }
 0x352   :  { %1992 = vmatprep.subr.mxu1 %v2837_v44  ;;  %v1977_v22 = vld [vmem:[#allocation3 + $0x70] sm:$0xff]  ;;  %v1975_v24 = vld [vmem:[#allocation3 + $0x60] sm:$0xff] }
 0x353   :  { %1993 = vmatpush1.msra.mxu1 %v1977_v22 }
 0x354   :  { %1994 = vmatprep.subr.mxu1 %v2837_v44 }
 0x355   :  { %1995 = vmatpush1.msra.mxu1 %v1976_v23 }
 0x356   :  { %1996 = vmatprep.subr.mxu1 %v2837_v44 }
 0x357   :  { %1997 = vmatpush1.msra.mxu1 %v1975_v24 }
 0x358   :  { %1998 = vmatprep.subr.mxu1 %v2837_v44 }
 0x359   :  { %v2805_v26 = vpop.f32.mrf.mxu1  ;;  %1999 = vmatpush1.msra.mxu1 %v1974_v25 }
 0x35a   :  { %1854 = vst.msk [vmem:[#allocation3 + $0x88] sm:$0xff] %vm141_vm1, %v2805_v26  ;;  %2000 = vmatprep.subr.mxu1 %v2837_v44 }
 0x35b   :  { %v1844_v28 = vpop.f32.mrf.mxu1  ;;  %2001 = vmatpush1.msra.mxu1 %v1973_v27 }
 0x35c   :  { %1853 = vst.msk [vmem:[#allocation3 + $0x80] sm:$0xff] %vm141_vm1, %v1844_v28  ;;  %2002 = vmatprep.subr.mxu1 %v2837_v44 }
 0x35d   :  { %2003 = vmatpush1.msra.mxu1 %v1972_v29 }
 0x35e   :  { %2004 = vmatprep.subr.mxu1 %v2837_v44 }
 0x35f   :  { %2005 = vmatpush1.msra.mxu1 %v1971_v30 }
 0x360   :  { %2006 = vmatprep.subr.mxu1 %v2837_v44 }
 0x361   :  { %2007 = vmatpush1.msra.mxu1 %v1970_v31  ;;  %v1980_v46 = vld [vmem:[#allocation3 + $0x88] sm:$0xff] }
 0x362   :  { %2008 = vmatprep.subr.mxu1 %v2837_v44 }
 0x363   :  { %2009 = vmatpush1.msra.mxu1 %v1969_v32  ;;  %v1979_v54 = vld [vmem:[#allocation3 + $0x80] sm:$0xff] }
 0x364   :  { %2010 = vmatprep.subr.mxu1 %v2837_v44 }
 0x365   :  { %2011 = vmatpush1.msra.mxu1 %v1968_v33 }
 0x366   :  { %2012 = vmatprep.subr.mxu1 %v2837_v44 }
 0x367   :  { %2013 = vmatpush1.msra.mxu1 %v1967_v34 }
 0x368   :  { %2014 = vmatprep.subr.mxu1 %v2837_v44 }
 0x369   :  { %2015 = vmatpush1.msra.mxu1 %v1966_v35 }
 0x36a   :  { %v2609_v37 = vpop.f32.mrf.mxu0  ;;  %2016 = vmatprep.subr.mxu1 %v2837_v44 }
 0x36b   :  { %2017 = vmatpush1.msra.mxu1 %v1965_v38 }
 0x36c   :  { %v2610_v39 = vpop.f32.mrf.mxu0  ;;  %2018 = vmatprep.subr.mxu1 %v2837_v44 }
 0x36d   :  { %v2611_v41 = vadd.f32 %v2610_v39, %v2609_v37  ;;  %2019 = vmatpush1.msra.mxu1 %v1964_v40 }
 0x36e   :  { %2020 = vmatprep.subr.mxu1 %v2837_v44 }
 0x36f   :  { %1957 = vst.msk [vmem:[#allocation3 + $0x90] sm:$0xff] %vm141_vm1, %v2611_v41  ;;  %2021 = vmatpush1.msra.mxu1 %v1963_v42 }
 0x370   :  { %2046 = vmatprep.subr.mxu1 %v2837_v44 }
 0x371   :  { %2047 = vmatpush2.msra.mxu1 %v1982_v43 }
 0x372   :  { %2048 = vmatprep.subr.mxu1 %v2837_v44 }
 0x376   :  { %v1981_v45 = vld [vmem:[#allocation3 + $0x90] sm:$0xff] }
 0x377   :  { %2049 = vmatpush2.msra.mxu1 %v1981_v45 }
 0x378   :  { %2050 = vmatprep.subr.mxu1 %v2837_v44 }
 0x379   :  { %2051 = vmatpush2.msra.mxu1 %v1980_v46 }
 0x37a   :  { %2052 = vmatprep.subr.mxu1 %v2837_v44 }
 0x37b   :  { %2053 = vmatpush2.msra.mxu1 %v1979_v54 }
 0x37c   :  { %2055 = vmatmul.mubr.f32.vlgmr.msra.gmra.mxu1 %v1959_v47 }
 0x37d   :  { %2159 = vmatprep.mubr.msk.f32.mxu1 %vm1983_vm3, %v1962_v48 }
 0x380   :  { %2060 = vmatmul.mubr.f32.gmra.mxu1 %v1961_v49 }
 0x43c   :  { %v2056_v50 = vpop.f32.mrf.mxu1 }
 0x43d   :  { %v2065_v51 = vmax.f32 %v2056_v50, 0.0 }
 0x43e   :  { %v2058_v52 = vpop.f32.mrf.mxu1 }
 0x43f   :  { %2067 = vst.msk [vmem:[%s3352_s6] sm:$0xff] %vm141_vm1, %v2065_v51 }
 0x440   :  { %v2061_v44 = vpop.f32.mrf.mxu1 }
 0x441   :  { %v2066_v53 = vmax.f32 %v2061_v44, 0.0 }
 0x442   :  { %v2063_v55 = vpop.f32.mrf.mxu1 }
 0x443   :  { %2068 = vst.msk [vmem:[%s3352_s6 + $0x8] sm:$0xff] %vm141_vm1, %v2066_v53 }
 0x444   :  { %2073 = vsyncpa [#allocation5], 1 }

</bundles_post_ra>
